<compile_context>
chip_gen: v5e
topology: v5e:2x2
jax: 0.10.0
libtpu: 0.0.40
codegen_flags: <defaults>
</compile_context>

<pallas_src>
import jax
import jax.numpy as jnp
from jax.experimental import pallas as pl
from jax.experimental.pallas import tpu as pltpu

INPUT_SIZE = 28
HIDDEN = 64
GATES = 4 * HIDDEN          # 256 — matches the MXU output width nicely
NUM_CLASSES = 10
OUT_LANES = 128             # lane-dense classifier output (cols >= 10 are zero)


def _round_up(n, m):
    return ((n + m - 1) // m) * m


def _tpu_plan():
    """Returns (num_tensorcores, vmem_limit_bytes_or_None, per-block VMEM budget)."""
    kind = ""
    try:
        kind = jax.devices()[0].device_kind.lower()
    except Exception:
        pass
    if "v7" in kind:
        # 2 TensorCores per chip, only 64 MiB VMEM per TC -> tighter budget.
        return 2, 40 << 20, 16 << 20
    if any(s in kind for s in ("v5e", "v5 lite", "v5lite", "v6")):
        # Single TC, 128 MiB physical VMEM -> raise the scoped limit, fat blocks.
        return 1, 96 << 20, 40 << 20
    # Unknown / older generation: stay conservative, keep default scoped limit.
    return 1, None, 12 << 20


# --------------------------------------------------------------------------
# Fused kernel: per batch block
#   1) pre_gates = x2d @ W_ih + (b_ih + b_hh)   (one MXU matmul -> VMEM scratch)
#   2) T-step LSTM recurrence  h @ W_hh + pre_gates[t]
#   3) classifier  h_T @ W_out + b_out          (lane-dense 128-wide output)
#
#   x_ref:    (T, B_BLK, INPUT_SIZE)    time-major, batch-padded input block
#   wih_ref:  (INPUT_SIZE, 4H)          gate cols permuted to (i, f, o, g)
#   b_ref:    (1, 4H)                   combined bias, same permutation (f32)
#   whh_ref:  (H, 4H)
#   wout_ref: (H, 128), bout_ref: (1, 128)   zero-padded beyond column 10
#   out_ref:  (B_BLK, 128)
#   pg_ref:   (T, B_BLK, 4H) f32 VMEM scratch (pre-gates)
# --------------------------------------------------------------------------
def lstm_fused_kernel(x_ref, wih_ref, b_ref, whh_ref, wout_ref, bout_ref,
                      out_ref, pg_ref):
    T, B_BLK, I = x_ref.shape

    # ---- (1) hoisted input projection: one big well-shaped MXU matmul.
    # Reshapes only merge/split leading dims (B_BLK % 8 == 0) -> tile-aligned.
    x2d = x_ref[...].reshape(T * B_BLK, I)
    pg = (
        jnp.dot(x2d, wih_ref[...], preferred_element_type=jnp.float32)
        + b_ref[...]
    )
    pg_ref[...] = pg.reshape(T, B_BLK, GATES)

    whh = whh_ref[...]                   # held live across the whole recurrence

    def step(t, carry):
        h, c = carry
        gates = (
            jnp.dot(h.astype(whh.dtype), whh, preferred_element_type=jnp.float32)
            + pg_ref[t]                  # cheap leading-axis index into scratch
        )
        # Permuted gate order (i, f, o, g): one contiguous sigmoid slab and one
        # contiguous tanh slab -> 2 EUP launches per step instead of 4.
        sig = jax.nn.sigmoid(gates[:, : 3 * HIDDEN])
        i_g = sig[:, :HIDDEN]
        f_g = sig[:, HIDDEN:2 * HIDDEN]
        o_g = sig[:, 2 * HIDDEN:3 * HIDDEN]
        g_g = jnp.tanh(gates[:, 3 * HIDDEN:])
        c = f_g * c + i_g * g_g
        h = o_g * jnp.tanh(c)
        return h, c

    h = jnp.zeros((B_BLK, HIDDEN), jnp.float32)
    c = jnp.zeros((B_BLK, HIDDEN), jnp.float32)

    if T <= 16 and B_BLK <= 256:
        # Tiny static trip count -> full unroll (max scheduler visibility).
        for t in range(T):
            h, c = step(t, (h, c))
    else:
        # Bounded unroll keeps vreg live ranges in check at large T / b_blk.
        h, c = jax.lax.fori_loop(0, T, step, (h, c), unroll=4)

    # ---- (3) classifier on the last hidden state (== r_out[:, -1, :]).
    out_ref[...] = (
        jnp.dot(h, wout_ref[...], preferred_element_type=jnp.float32)
        + bout_ref[...]
    )


# --------------------------------------------------------------------------
# Wrapper
# --------------------------------------------------------------------------
def rnn_forward(x, params, *, matmul_dtype=jnp.float32):
    """x: (B, T, INPUT_SIZE) float32, batch_first — same as the PyTorch module.

    matmul_dtype=jnp.bfloat16 feeds the MXU in bf16 (valid on v5e/v6e/v7x);
    accumulation and all gate / elementwise math stay in f32.
    """
    B, T, I = x.shape
    assert I == INPUT_SIZE

    # --- weight prep: transpose to (in, out), permute gates i,f,g,o -> i,f,o,g
    perm = jnp.concatenate([
        jnp.arange(0, HIDDEN),                 # i
        jnp.arange(HIDDEN, 2 * HIDDEN),        # f
        jnp.arange(3 * HIDDEN, 4 * HIDDEN),    # o
        jnp.arange(2 * HIDDEN, 3 * HIDDEN),    # g
    ])
    wih = params["w_ih"][perm, :].T.astype(matmul_dtype)              # (I, 4H)
    whh = params["w_hh"][perm, :].T.astype(matmul_dtype)              # (H, 4H)
    b = (params["b_ih"] + params["b_hh"])[perm].reshape(1, GATES).astype(jnp.float32)
    # Lane-dense classifier weights: zero-pad output dim 10 -> 128.
    wout = jnp.zeros((HIDDEN, OUT_LANES), jnp.float32)
    wout = wout.at[:, :NUM_CLASSES].set(params["w_out"].T.astype(jnp.float32))
    bout = jnp.zeros((1, OUT_LANES), jnp.float32)
    bout = bout.at[:, :NUM_CLASSES].set(params["b_out"].astype(jnp.float32))

    # --- generation-aware batch blocking.
    num_tc, vmem_limit, blk_budget = _tpu_plan()
    x_bytes = jnp.dtype(matmul_dtype).itemsize
    b_pad0 = _round_up(max(B, 8), 8)

    # VMEM bytes per batch row inside one block:
    #   pre-gate scratch + double-buffered x tile (28 lanes pad to 128) + slack
    per_row = (T * GATES * 4
               + 2 * T * 128 * x_bytes
               + 4 * GATES * 4)
    rows_cap = max(8, (blk_budget // per_row) // 8 * 8)

    # One block per TensorCore if it fits the VMEM budget; then re-balance the
    # block size so batches just over a block boundary waste at most 8 rows.
    target = min(rows_cap, _round_up(pl.cdiv(b_pad0, num_tc), 8))
    n_blk = pl.cdiv(b_pad0, target)
    b_blk = _round_up(pl.cdiv(b_pad0, n_blk), 8)
    b_pad = n_blk * b_blk

    # Time-major + batch padding (padded rows compute garbage, sliced off).
    x_tm = jnp.transpose(x.astype(jnp.float32), (1, 0, 2))            # (T, B, I)
    x_tm = jnp.pad(x_tm, ((0, 0), (0, b_pad - B), (0, 0))).astype(matmul_dtype)

    out_pad = pl.pallas_call(
        lstm_fused_kernel,
        out_shape=jax.ShapeDtypeStruct((b_pad, OUT_LANES), jnp.float32),
        grid=(b_pad // b_blk,),
        in_specs=[
            pl.BlockSpec((T, b_blk, I), lambda i: (0, i, 0)),
            pl.BlockSpec((I, GATES), lambda i: (0, 0)),
            pl.BlockSpec((1, GATES), lambda i: (0, 0)),
            pl.BlockSpec((HIDDEN, GATES), lambda i: (0, 0)),
            pl.BlockSpec((HIDDEN, OUT_LANES), lambda i: (0, 0)),
            pl.BlockSpec((1, OUT_LANES), lambda i: (0, 0)),
        ],
        out_specs=pl.BlockSpec((b_blk, OUT_LANES), lambda i: (i, 0)),
        scratch_shapes=[pltpu.VMEM((T, b_blk, GATES), jnp.float32)],
        compiler_params=pltpu.CompilerParams(
            dimension_semantics=("parallel",),
            vmem_limit_bytes=vmem_limit),
    )(x_tm, wih, b, whh, wout, bout)

    return out_pad[:B, :NUM_CLASSES]


# --------------------------------------------------------------------------
# Init + pure-JAX reference
# --------------------------------------------------------------------------
def init_params(key):
    """Deterministic init matching PyTorch shapes (uniform(-k, k), k=1/sqrt(H))."""
    k = 1.0 / jnp.sqrt(jnp.float32(HIDDEN))
    ks = jax.random.split(key, 6)
    u = lambda kk, shape: jax.random.uniform(kk, shape, jnp.float32, -k, k)
    return {
        "w_ih": u(ks[0], (4 * HIDDEN, INPUT_SIZE)),   # weight_ih_l0 (i,f,g,o rows)
        "w_hh": u(ks[1], (4 * HIDDEN, HIDDEN)),       # weight_hh_l0
        "b_ih": u(ks[2], (4 * HIDDEN,)),              # bias_ih_l0
        "b_hh": u(ks[3], (4 * HIDDEN,)),              # bias_hh_l0
        "w_out": u(ks[4], (NUM_CLASSES, HIDDEN)),     # out.weight
        "b_out": u(ks[5], (NUM_CLASSES,)),            # out.bias
    }


def rnn_forward_ref(x, params):
    """Pure-JAX reference (PyTorch semantics, i/f/g/o gate order)."""
    B, T, _ = x.shape
    wih, whh = params["w_ih"].T, params["w_hh"].T
    b = params["b_ih"] + params["b_hh"]
    h = jnp.zeros((B, HIDDEN), jnp.float32)
    c = jnp.zeros((B, HIDDEN), jnp.float32)
    for t in range(T):
        gates = x[:, t, :] @ wih + h @ whh + b
        i = jax.nn.sigmoid(gates[:, :HIDDEN])
        f = jax.nn.sigmoid(gates[:, HIDDEN:2 * HIDDEN])
        g = jnp.tanh(gates[:, 2 * HIDDEN:3 * HIDDEN])
        o = jax.nn.sigmoid(gates[:, 3 * HIDDEN:])
        c = f * c + i * g
        h = o * jnp.tanh(c)
    return h @ params["w_out"].T + params["b_out"]


if __name__ == "__main__":
    key = jax.random.PRNGKey(0)
    pkey, xkey, xkey2 = jax.random.split(key, 3)
    params = init_params(pkey)

    # --- small shape (unrolled recurrence path), exact f32 semantics.
    B, T = 2, 8
    x = jax.random.normal(xkey, (B, T, INPUT_SIZE), jnp.float32)
    ref = rnn_forward_ref(x, params)
    out = jax.block_until_ready(rnn_forward(x, params))
    assert out.shape == (B, NUM_CLASSES)
    assert jnp.allclose(out, ref, atol=1e-4, rtol=1e-4)

    # --- bf16-MXU path (same math, f32 accumulation, looser tolerance).
    out_bf16 = jax.block_until_ready(
        rnn_forward(x, params, matmul_dtype=jnp.bfloat16))
    assert jnp.allclose(out_bf16, ref, atol=2e-2, rtol=2e-2)

    # --- MNIST-row-like shape (fori_loop recurrence path), f32.
    B2, T2 = 20, 28
    x2 = jax.random.normal(xkey2, (B2, T2, INPUT_SIZE), jnp.float32)
    ref2 = rnn_forward_ref(x2, params)
    out2 = jax.block_until_ready(rnn_forward(x2, params))
    assert out2.shape == (B2, NUM_CLASSES)
    assert jnp.allclose(out2, ref2, atol=1e-3, rtol=1e-3)

    print("KERNEL_OK")
</pallas_src>

<mosaic_0001>
module attributes {stable_mosaic.version = 11 : i64} {
  func.func @lstm_fused_kernel(%arg0: i32, %arg1: memref<8x8x28xf32, #tpu.memory_space<vmem>>, %arg2: memref<28x256xf32, #tpu.memory_space<vmem>>, %arg3: memref<1x256xf32, #tpu.memory_space<vmem>>, %arg4: memref<64x256xf32, #tpu.memory_space<vmem>>, %arg5: memref<64x128xf32, #tpu.memory_space<vmem>>, %arg6: memref<1x128xf32, #tpu.memory_space<vmem>>, %arg7: memref<8x128xf32, #tpu.memory_space<vmem>>, %arg8: memref<8x8x256xf32, #tpu.memory_space<vmem>>) attributes {dimension_semantics = [#tpu.dimension_semantics<parallel>], iteration_bounds = array<i64: 1>, scalar_prefetch = 0 : i64, scratch_operands = 1 : i64, tpu.core_type = #tpu.core_type<tc>, window_params = [{transform_indices = @transform_0, window_bounds = array<i64: 8, 8, 28>}, {pipeline_mode = #tpu.pipeline_mode<synchronous>, transform_indices = @transform_1, window_bounds = array<i64: 28, 256>}, {pipeline_mode = #tpu.pipeline_mode<synchronous>, transform_indices = @transform_2, window_bounds = array<i64: 1, 256>}, {pipeline_mode = #tpu.pipeline_mode<synchronous>, transform_indices = @transform_3, window_bounds = array<i64: 64, 256>}, {pipeline_mode = #tpu.pipeline_mode<synchronous>, transform_indices = @transform_4, window_bounds = array<i64: 64, 128>}, {pipeline_mode = #tpu.pipeline_mode<synchronous>, transform_indices = @transform_5, window_bounds = array<i64: 1, 128>}, {transform_indices = @transform_6, window_bounds = array<i64: 8, 128>}]} {
    %c0 = arith.constant 0 : index
    %c0_0 = arith.constant 0 : index
    %c0_1 = arith.constant 0 : index
    %0 = vector.load %arg1[%c0, %c0_0, %c0_1] : memref<8x8x28xf32, #tpu.memory_space<vmem>>, vector<8x8x28xf32>
    %1 = vector.shape_cast %0 : vector<8x8x28xf32> to vector<64x28xf32>
    %c0_2 = arith.constant 0 : index
    %c0_3 = arith.constant 0 : index
    %2 = vector.load %arg2[%c0_2, %c0_3] : memref<28x256xf32, #tpu.memory_space<vmem>>, vector<28x256xf32>
    %cst = arith.constant dense<0.000000e+00> : vector<64x256xf32>
    %3 = tpu.matmul %1, %2, %cst {dimension_numbers = #tpu.dot_dimension_numbers<[1], [0], [0], [1], [0, 0, 1, 1], [], []>} : vector<64x28xf32>, vector<28x256xf32>, vector<64x256xf32> -> vector<64x256xf32>
    %c0_4 = arith.constant 0 : index
    %c0_5 = arith.constant 0 : index
    %4 = vector.load %arg3[%c0_4, %c0_5] : memref<1x256xf32, #tpu.memory_space<vmem>>, vector<1x256xf32>
    %5 = vector.broadcast %4 : vector<1x256xf32> to vector<64x256xf32>
    %6 = arith.addf %3, %5 : vector<64x256xf32>
    %7 = vector.shape_cast %6 : vector<64x256xf32> to vector<8x8x256xf32>
    %c0_6 = arith.constant 0 : index
    %c0_7 = arith.constant 0 : index
    %c0_8 = arith.constant 0 : index
    %8 = vector.load %arg8[%c0_6, %c0_7, %c0_8] : memref<8x8x256xf32, #tpu.memory_space<vmem>>, vector<8x8x256xf32>
    tpu.vector_store %arg8[%c0_6, %c0_7, %c0_8], %7 {strides = array<i32>} : memref<8x8x256xf32, #tpu.memory_space<vmem>>, vector<8x8x256xf32>,
    %c0_9 = arith.constant 0 : index
    %c0_10 = arith.constant 0 : index
    %9 = vector.load %arg4[%c0_9, %c0_10] : memref<64x256xf32, #tpu.memory_space<vmem>>, vector<64x256xf32>
    %cst_11 = arith.constant 0.000000e+00 : f32
    %10 = vector.broadcast %cst_11 : f32 to vector<8x64xf32>
    %cst_12 = arith.constant 0.000000e+00 : f32
    %11 = vector.broadcast %cst_12 : f32 to vector<8x64xf32>
    %cst_13 = arith.constant dense<0.000000e+00> : vector<8x256xf32>
    %12 = tpu.matmul %10, %9, %cst_13 {dimension_numbers = #tpu.dot_dimension_numbers<[1], [0], [0], [1], [0, 0, 1, 1], [], []>} : vector<8x64xf32>, vector<64x256xf32>, vector<8x256xf32> -> vector<8x256xf32>
    %c0_14 = arith.constant 0 : index
    %c0_15 = arith.constant 0 : index
    %c0_16 = arith.constant 0 : index
    %13 = vector.load %arg8[%c0_14, %c0_15, %c0_16] : memref<8x8x256xf32, #tpu.memory_space<vmem>>, vector<1x8x256xf32>
    %14 = vector.shape_cast %13 : vector<1x8x256xf32> to vector<8x256xf32>
    %15 = arith.addf %12, %14 : vector<8x256xf32>
    %16 = vector.extract_strided_slice %15 {offsets = [0, 0], sizes = [8, 192], strides = [1, 1]} : vector<8x256xf32> to vector<8x192xf32>
    %17 = arith.negf %16 : vector<8x192xf32>
    %18 = math.exp %17 : vector<8x192xf32>
    %cst_17 = arith.constant 1.000000e+00 : f32
    %19 = vector.broadcast %cst_17 : f32 to vector<8x192xf32>
    %20 = arith.addf %19, %18 : vector<8x192xf32>
    %21 = arith.divf %19, %20 : vector<8x192xf32>
    %22 = vector.extract_strided_slice %21 {offsets = [0, 0], sizes = [8, 64], strides = [1, 1]} : vector<8x192xf32> to vector<8x64xf32>
    %23 = vector.extract_strided_slice %21 {offsets = [0, 64], sizes = [8, 64], strides = [1, 1]} : vector<8x192xf32> to vector<8x64xf32>
    %24 = vector.extract_strided_slice %21 {offsets = [0, 128], sizes = [8, 64], strides = [1, 1]} : vector<8x192xf32> to vector<8x64xf32>
    %25 = vector.extract_strided_slice %15 {offsets = [0, 192], sizes = [8, 64], strides = [1, 1]} : vector<8x256xf32> to vector<8x64xf32>
    %26 = math.tanh %25 : vector<8x64xf32>
    %27 = arith.mulf %23, %11 : vector<8x64xf32>
    %28 = arith.mulf %22, %26 : vector<8x64xf32>
    %29 = arith.addf %27, %28 : vector<8x64xf32>
    %30 = math.tanh %29 : vector<8x64xf32>
    %31 = arith.mulf %24, %30 : vector<8x64xf32>
    %cst_18 = arith.constant dense<0.000000e+00> : vector<8x256xf32>
    %32 = tpu.matmul %31, %9, %cst_18 {dimension_numbers = #tpu.dot_dimension_numbers<[1], [0], [0], [1], [0, 0, 1, 1], [], []>} : vector<8x64xf32>, vector<64x256xf32>, vector<8x256xf32> -> vector<8x256xf32>
    %c1 = arith.constant 1 : index
    %c0_19 = arith.constant 0 : index
    %c0_20 = arith.constant 0 : index
    %33 = vector.load %arg8[%c1, %c0_19, %c0_20] : memref<8x8x256xf32, #tpu.memory_space<vmem>>, vector<1x8x256xf32>
    %34 = vector.shape_cast %33 : vector<1x8x256xf32> to vector<8x256xf32>
    %35 = arith.addf %32, %34 : vector<8x256xf32>
    %36 = vector.extract_strided_slice %35 {offsets = [0, 0], sizes = [8, 192], strides = [1, 1]} : vector<8x256xf32> to vector<8x192xf32>
    %37 = arith.negf %36 : vector<8x192xf32>
    %38 = math.exp %37 : vector<8x192xf32>
    %cst_21 = arith.constant 1.000000e+00 : f32
    %39 = vector.broadcast %cst_21 : f32 to vector<8x192xf32>
    %40 = arith.addf %39, %38 : vector<8x192xf32>
    %41 = arith.divf %39, %40 : vector<8x192xf32>
    %42 = vector.extract_strided_slice %41 {offsets = [0, 0], sizes = [8, 64], strides = [1, 1]} : vector<8x192xf32> to vector<8x64xf32>
    %43 = vector.extract_strided_slice %41 {offsets = [0, 64], sizes = [8, 64], strides = [1, 1]} : vector<8x192xf32> to vector<8x64xf32>
    %44 = vector.extract_strided_slice %41 {offsets = [0, 128], sizes = [8, 64], strides = [1, 1]} : vector<8x192xf32> to vector<8x64xf32>
    %45 = vector.extract_strided_slice %35 {offsets = [0, 192], sizes = [8, 64], strides = [1, 1]} : vector<8x256xf32> to vector<8x64xf32>
    %46 = math.tanh %45 : vector<8x64xf32>
    %47 = arith.mulf %43, %29 : vector<8x64xf32>
    %48 = arith.mulf %42, %46 : vector<8x64xf32>
    %49 = arith.addf %47, %48 : vector<8x64xf32>
    %50 = math.tanh %49 : vector<8x64xf32>
    %51 = arith.mulf %44, %50 : vector<8x64xf32>
    %cst_22 = arith.constant dense<0.000000e+00> : vector<8x256xf32>
    %52 = tpu.matmul %51, %9, %cst_22 {dimension_numbers = #tpu.dot_dimension_numbers<[1], [0], [0], [1], [0, 0, 1, 1], [], []>} : vector<8x64xf32>, vector<64x256xf32>, vector<8x256xf32> -> vector<8x256xf32>
    %c2 = arith.constant 2 : index
    %c0_23 = arith.constant 0 : index
    %c0_24 = arith.constant 0 : index
    %53 = vector.load %arg8[%c2, %c0_23, %c0_24] : memref<8x8x256xf32, #tpu.memory_space<vmem>>, vector<1x8x256xf32>
    %54 = vector.shape_cast %53 : vector<1x8x256xf32> to vector<8x256xf32>
    %55 = arith.addf %52, %54 : vector<8x256xf32>
    %56 = vector.extract_strided_slice %55 {offsets = [0, 0], sizes = [8, 192], strides = [1, 1]} : vector<8x256xf32> to vector<8x192xf32>
    %57 = arith.negf %56 : vector<8x192xf32>
    %58 = math.exp %57 : vector<8x192xf32>
    %cst_25 = arith.constant 1.000000e+00 : f32
    %59 = vector.broadcast %cst_25 : f32 to vector<8x192xf32>
    %60 = arith.addf %59, %58 : vector<8x192xf32>
    %61 = arith.divf %59, %60 : vector<8x192xf32>
    %62 = vector.extract_strided_slice %61 {offsets = [0, 0], sizes = [8, 64], strides = [1, 1]} : vector<8x192xf32> to vector<8x64xf32>
    %63 = vector.extract_strided_slice %61 {offsets = [0, 64], sizes = [8, 64], strides = [1, 1]} : vector<8x192xf32> to vector<8x64xf32>
    %64 = vector.extract_strided_slice %61 {offsets = [0, 128], sizes = [8, 64], strides = [1, 1]} : vector<8x192xf32> to vector<8x64xf32>
    %65 = vector.extract_strided_slice %55 {offsets = [0, 192], sizes = [8, 64], strides = [1, 1]} : vector<8x256xf32> to vector<8x64xf32>
    %66 = math.tanh %65 : vector<8x64xf32>
    %67 = arith.mulf %63, %49 : vector<8x64xf32>
    %68 = arith.mulf %62, %66 : vector<8x64xf32>
    %69 = arith.addf %67, %68 : vector<8x64xf32>
    %70 = math.tanh %69 : vector<8x64xf32>
    %71 = arith.mulf %64, %70 : vector<8x64xf32>
    %cst_26 = arith.constant dense<0.000000e+00> : vector<8x256xf32>
    %72 = tpu.matmul %71, %9, %cst_26 {dimension_numbers = #tpu.dot_dimension_numbers<[1], [0], [0], [1], [0, 0, 1, 1], [], []>} : vector<8x64xf32>, vector<64x256xf32>, vector<8x256xf32> -> vector<8x256xf32>
    %c3 = arith.constant 3 : index
    %c0_27 = arith.constant 0 : index
    %c0_28 = arith.constant 0 : index
    %73 = vector.load %arg8[%c3, %c0_27, %c0_28] : memref<8x8x256xf32, #tpu.memory_space<vmem>>, vector<1x8x256xf32>
    %74 = vector.shape_cast %73 : vector<1x8x256xf32> to vector<8x256xf32>
    %75 = arith.addf %72, %74 : vector<8x256xf32>
    %76 = vector.extract_strided_slice %75 {offsets = [0, 0], sizes = [8, 192], strides = [1, 1]} : vector<8x256xf32> to vector<8x192xf32>
    %77 = arith.negf %76 : vector<8x192xf32>
    %78 = math.exp %77 : vector<8x192xf32>
    %cst_29 = arith.constant 1.000000e+00 : f32
    %79 = vector.broadcast %cst_29 : f32 to vector<8x192xf32>
    %80 = arith.addf %79, %78 : vector<8x192xf32>
    %81 = arith.divf %79, %80 : vector<8x192xf32>
    %82 = vector.extract_strided_slice %81 {offsets = [0, 0], sizes = [8, 64], strides = [1, 1]} : vector<8x192xf32> to vector<8x64xf32>
    %83 = vector.extract_strided_slice %81 {offsets = [0, 64], sizes = [8, 64], strides = [1, 1]} : vector<8x192xf32> to vector<8x64xf32>
    %84 = vector.extract_strided_slice %81 {offsets = [0, 128], sizes = [8, 64], strides = [1, 1]} : vector<8x192xf32> to vector<8x64xf32>
    %85 = vector.extract_strided_slice %75 {offsets = [0, 192], sizes = [8, 64], strides = [1, 1]} : vector<8x256xf32> to vector<8x64xf32>
    %86 = math.tanh %85 : vector<8x64xf32>
    %87 = arith.mulf %83, %69 : vector<8x64xf32>
    %88 = arith.mulf %82, %86 : vector<8x64xf32>
    %89 = arith.addf %87, %88 : vector<8x64xf32>
    %90 = math.tanh %89 : vector<8x64xf32>
    %91 = arith.mulf %84, %90 : vector<8x64xf32>
    %cst_30 = arith.constant dense<0.000000e+00> : vector<8x256xf32>
    %92 = tpu.matmul %91, %9, %cst_30 {dimension_numbers = #tpu.dot_dimension_numbers<[1], [0], [0], [1], [0, 0, 1, 1], [], []>} : vector<8x64xf32>, vector<64x256xf32>, vector<8x256xf32> -> vector<8x256xf32>
    %c4 = arith.constant 4 : index
    %c0_31 = arith.constant 0 : index
    %c0_32 = arith.constant 0 : index
    %93 = vector.load %arg8[%c4, %c0_31, %c0_32] : memref<8x8x256xf32, #tpu.memory_space<vmem>>, vector<1x8x256xf32>
    %94 = vector.shape_cast %93 : vector<1x8x256xf32> to vector<8x256xf32>
    %95 = arith.addf %92, %94 : vector<8x256xf32>
    %96 = vector.extract_strided_slice %95 {offsets = [0, 0], sizes = [8, 192], strides = [1, 1]} : vector<8x256xf32> to vector<8x192xf32>
    %97 = arith.negf %96 : vector<8x192xf32>
    %98 = math.exp %97 : vector<8x192xf32>
    %cst_33 = arith.constant 1.000000e+00 : f32
    %99 = vector.broadcast %cst_33 : f32 to vector<8x192xf32>
    %100 = arith.addf %99, %98 : vector<8x192xf32>
    %101 = arith.divf %99, %100 : vector<8x192xf32>
    %102 = vector.extract_strided_slice %101 {offsets = [0, 0], sizes = [8, 64], strides = [1, 1]} : vector<8x192xf32> to vector<8x64xf32>
    %103 = vector.extract_strided_slice %101 {offsets = [0, 64], sizes = [8, 64], strides = [1, 1]} : vector<8x192xf32> to vector<8x64xf32>
    %104 = vector.extract_strided_slice %101 {offsets = [0, 128], sizes = [8, 64], strides = [1, 1]} : vector<8x192xf32> to vector<8x64xf32>
    %105 = vector.extract_strided_slice %95 {offsets = [0, 192], sizes = [8, 64], strides = [1, 1]} : vector<8x256xf32> to vector<8x64xf32>
    %106 = math.tanh %105 : vector<8x64xf32>
    %107 = arith.mulf %103, %89 : vector<8x64xf32>
    %108 = arith.mulf %102, %106 : vector<8x64xf32>
    %109 = arith.addf %107, %108 : vector<8x64xf32>
    %110 = math.tanh %109 : vector<8x64xf32>
    %111 = arith.mulf %104, %110 : vector<8x64xf32>
    %cst_34 = arith.constant dense<0.000000e+00> : vector<8x256xf32>
    %112 = tpu.matmul %111, %9, %cst_34 {dimension_numbers = #tpu.dot_dimension_numbers<[1], [0], [0], [1], [0, 0, 1, 1], [], []>} : vector<8x64xf32>, vector<64x256xf32>, vector<8x256xf32> -> vector<8x256xf32>
    %c5 = arith.constant 5 : index
    %c0_35 = arith.constant 0 : index
    %c0_36 = arith.constant 0 : index
    %113 = vector.load %arg8[%c5, %c0_35, %c0_36] : memref<8x8x256xf32, #tpu.memory_space<vmem>>, vector<1x8x256xf32>
    %114 = vector.shape_cast %113 : vector<1x8x256xf32> to vector<8x256xf32>
    %115 = arith.addf %112, %114 : vector<8x256xf32>
    %116 = vector.extract_strided_slice %115 {offsets = [0, 0], sizes = [8, 192], strides = [1, 1]} : vector<8x256xf32> to vector<8x192xf32>
    %117 = arith.negf %116 : vector<8x192xf32>
    %118 = math.exp %117 : vector<8x192xf32>
    %cst_37 = arith.constant 1.000000e+00 : f32
    %119 = vector.broadcast %cst_37 : f32 to vector<8x192xf32>
    %120 = arith.addf %119, %118 : vector<8x192xf32>
    %121 = arith.divf %119, %120 : vector<8x192xf32>
    %122 = vector.extract_strided_slice %121 {offsets = [0, 0], sizes = [8, 64], strides = [1, 1]} : vector<8x192xf32> to vector<8x64xf32>
    %123 = vector.extract_strided_slice %121 {offsets = [0, 64], sizes = [8, 64], strides = [1, 1]} : vector<8x192xf32> to vector<8x64xf32>
    %124 = vector.extract_strided_slice %121 {offsets = [0, 128], sizes = [8, 64], strides = [1, 1]} : vector<8x192xf32> to vector<8x64xf32>
    %125 = vector.extract_strided_slice %115 {offsets = [0, 192], sizes = [8, 64], strides = [1, 1]} : vector<8x256xf32> to vector<8x64xf32>
    %126 = math.tanh %125 : vector<8x64xf32>
    %127 = arith.mulf %123, %109 : vector<8x64xf32>
    %128 = arith.mulf %122, %126 : vector<8x64xf32>
    %129 = arith.addf %127, %128 : vector<8x64xf32>
    %130 = math.tanh %129 : vector<8x64xf32>
    %131 = arith.mulf %124, %130 : vector<8x64xf32>
    %cst_38 = arith.constant dense<0.000000e+00> : vector<8x256xf32>
    %132 = tpu.matmul %131, %9, %cst_38 {dimension_numbers = #tpu.dot_dimension_numbers<[1], [0], [0], [1], [0, 0, 1, 1], [], []>} : vector<8x64xf32>, vector<64x256xf32>, vector<8x256xf32> -> vector<8x256xf32>
    %c6 = arith.constant 6 : index
    %c0_39 = arith.constant 0 : index
    %c0_40 = arith.constant 0 : index
    %133 = vector.load %arg8[%c6, %c0_39, %c0_40] : memref<8x8x256xf32, #tpu.memory_space<vmem>>, vector<1x8x256xf32>
    %134 = vector.shape_cast %133 : vector<1x8x256xf32> to vector<8x256xf32>
    %135 = arith.addf %132, %134 : vector<8x256xf32>
    %136 = vector.extract_strided_slice %135 {offsets = [0, 0], sizes = [8, 192], strides = [1, 1]} : vector<8x256xf32> to vector<8x192xf32>
    %137 = arith.negf %136 : vector<8x192xf32>
    %138 = math.exp %137 : vector<8x192xf32>
    %cst_41 = arith.constant 1.000000e+00 : f32
    %139 = vector.broadcast %cst_41 : f32 to vector<8x192xf32>
    %140 = arith.addf %139, %138 : vector<8x192xf32>
    %141 = arith.divf %139, %140 : vector<8x192xf32>
    %142 = vector.extract_strided_slice %141 {offsets = [0, 0], sizes = [8, 64], strides = [1, 1]} : vector<8x192xf32> to vector<8x64xf32>
    %143 = vector.extract_strided_slice %141 {offsets = [0, 64], sizes = [8, 64], strides = [1, 1]} : vector<8x192xf32> to vector<8x64xf32>
    %144 = vector.extract_strided_slice %141 {offsets = [0, 128], sizes = [8, 64], strides = [1, 1]} : vector<8x192xf32> to vector<8x64xf32>
    %145 = vector.extract_strided_slice %135 {offsets = [0, 192], sizes = [8, 64], strides = [1, 1]} : vector<8x256xf32> to vector<8x64xf32>
    %146 = math.tanh %145 : vector<8x64xf32>
    %147 = arith.mulf %143, %129 : vector<8x64xf32>
    %148 = arith.mulf %142, %146 : vector<8x64xf32>
    %149 = arith.addf %147, %148 : vector<8x64xf32>
    %150 = math.tanh %149 : vector<8x64xf32>
    %151 = arith.mulf %144, %150 : vector<8x64xf32>
    %cst_42 = arith.constant dense<0.000000e+00> : vector<8x256xf32>
    %152 = tpu.matmul %151, %9, %cst_42 {dimension_numbers = #tpu.dot_dimension_numbers<[1], [0], [0], [1], [0, 0, 1, 1], [], []>} : vector<8x64xf32>, vector<64x256xf32>, vector<8x256xf32> -> vector<8x256xf32>
    %c7 = arith.constant 7 : index
    %c0_43 = arith.constant 0 : index
    %c0_44 = arith.constant 0 : index
    %153 = vector.load %arg8[%c7, %c0_43, %c0_44] : memref<8x8x256xf32, #tpu.memory_space<vmem>>, vector<1x8x256xf32>
    %154 = vector.shape_cast %153 : vector<1x8x256xf32> to vector<8x256xf32>
    %155 = arith.addf %152, %154 : vector<8x256xf32>
    %156 = vector.extract_strided_slice %155 {offsets = [0, 0], sizes = [8, 192], strides = [1, 1]} : vector<8x256xf32> to vector<8x192xf32>
    %157 = arith.negf %156 : vector<8x192xf32>
    %158 = math.exp %157 : vector<8x192xf32>
    %cst_45 = arith.constant 1.000000e+00 : f32
    %159 = vector.broadcast %cst_45 : f32 to vector<8x192xf32>
    %160 = arith.addf %159, %158 : vector<8x192xf32>
    %161 = arith.divf %159, %160 : vector<8x192xf32>
    %162 = vector.extract_strided_slice %161 {offsets = [0, 0], sizes = [8, 64], strides = [1, 1]} : vector<8x192xf32> to vector<8x64xf32>
    %163 = vector.extract_strided_slice %161 {offsets = [0, 64], sizes = [8, 64], strides = [1, 1]} : vector<8x192xf32> to vector<8x64xf32>
    %164 = vector.extract_strided_slice %161 {offsets = [0, 128], sizes = [8, 64], strides = [1, 1]} : vector<8x192xf32> to vector<8x64xf32>
    %165 = vector.extract_strided_slice %155 {offsets = [0, 192], sizes = [8, 64], strides = [1, 1]} : vector<8x256xf32> to vector<8x64xf32>
    %166 = math.tanh %165 : vector<8x64xf32>
    %167 = arith.mulf %163, %149 : vector<8x64xf32>
    %168 = arith.mulf %162, %166 : vector<8x64xf32>
    %169 = arith.addf %167, %168 : vector<8x64xf32>
    %170 = math.tanh %169 : vector<8x64xf32>
    %171 = arith.mulf %164, %170 : vector<8x64xf32>
    %c0_46 = arith.constant 0 : index
    %c0_47 = arith.constant 0 : index
    %172 = vector.load %arg5[%c0_46, %c0_47] : memref<64x128xf32, #tpu.memory_space<vmem>>, vector<64x128xf32>
    %cst_48 = arith.constant dense<0.000000e+00> : vector<8x128xf32>
    %173 = tpu.matmul %171, %172, %cst_48 {dimension_numbers = #tpu.dot_dimension_numbers<[1], [0], [0], [1], [0, 0, 1, 1], [], []>} : vector<8x64xf32>, vector<64x128xf32>, vector<8x128xf32> -> vector<8x128xf32>
    %c0_49 = arith.constant 0 : index
    %c0_50 = arith.constant 0 : index
    %174 = vector.load %arg6[%c0_49, %c0_50] : memref<1x128xf32, #tpu.memory_space<vmem>>, vector<1x128xf32>
    %175 = vector.broadcast %174 : vector<1x128xf32> to vector<8x128xf32>
    %176 = arith.addf %173, %175 : vector<8x128xf32>
    %c0_51 = arith.constant 0 : index
    %c0_52 = arith.constant 0 : index
    %177 = vector.load %arg7[%c0_51, %c0_52] : memref<8x128xf32, #tpu.memory_space<vmem>>, vector<8x128xf32>
    tpu.vector_store %arg7[%c0_51, %c0_52], %176 {strides = array<i32>} : memref<8x128xf32, #tpu.memory_space<vmem>>, vector<8x128xf32>,
    return
  }
  func.func @transform_0(%arg0: i32) -> (i32, i32, i32) {
    %c0_i32 = arith.constant 0 : i32
    %c0_i32_0 = arith.constant 0 : i32
    %c0_i32_1 = arith.constant 0 : i32
    return %c0_i32, %arg0, %c0_i32_0 : i32, i32, i32
  }
  func.func @transform_1(%arg0: i32) -> (i32, i32) {
    %c0_i32 = arith.constant 0 : i32
    %c0_i32_0 = arith.constant 0 : i32
    %c0_i32_1 = arith.constant 0 : i32
    return %c0_i32, %c0_i32_0 : i32, i32
  }
  func.func @transform_2(%arg0: i32) -> (i32, i32) {
    %c0_i32 = arith.constant 0 : i32
    %c0_i32_0 = arith.constant 0 : i32
    %c0_i32_1 = arith.constant 0 : i32
    return %c0_i32, %c0_i32_0 : i32, i32
  }
  func.func @transform_3(%arg0: i32) -> (i32, i32) {
    %c0_i32 = arith.constant 0 : i32
    %c0_i32_0 = arith.constant 0 : i32
    %c0_i32_1 = arith.constant 0 : i32
    return %c0_i32, %c0_i32_0 : i32, i32
  }
  func.func @transform_4(%arg0: i32) -> (i32, i32) {
    %c0_i32 = arith.constant 0 : i32
    %c0_i32_0 = arith.constant 0 : i32
    %c0_i32_1 = arith.constant 0 : i32
    return %c0_i32, %c0_i32_0 : i32, i32
  }
  func.func @transform_5(%arg0: i32) -> (i32, i32) {
    %c0_i32 = arith.constant 0 : i32
    %c0_i32_0 = arith.constant 0 : i32
    %c0_i32_1 = arith.constant 0 : i32
    return %c0_i32, %c0_i32_0 : i32, i32
  }
  func.func @transform_6(%arg0: i32) -> (i32, i32) {
    %c0_i32 = arith.constant 0 : i32
    %c0_i32_0 = arith.constant 0 : i32
    return %arg0, %c0_i32 : i32, i32
  }
}

</mosaic_0001>

<bundles_post_ra>
// kernel: tpu_custom_call.1
= control target key start
LH: loop header
LB: loop body
LE: loop exit
PB: predicated region body
PF: predicated region fallthrough
CT: control target
= control target key end

     0   :  { %11 = vsyncpa [#allocation4], 0  ;;  %s1801_s0 = inlined_call_operand.hbm [shape: f32[8,8,28], index: 0, kind: input, shape index: {}]   ;;  %s1802_s1 = inlined_call_operand.hbm [shape: f32[28,256], index: 1, kind: input, shape index: {}]   ;;  %s1803_s2 = inlined_call_operand.hbm [shape: f32[1,256], index: 2, kind: input, shape index: {}]   ;;  %s1804_s3 = inlined_call_operand.hbm [shape: f32[64,256], index: 3, kind: input, shape index: {}]   ;;  %s1805_s4 = inlined_call_operand.hbm [shape: f32[64,128], index: 4, kind: input, shape index: {}]   ;;  %s1806_s5 = inlined_call_operand.vmem [shape: f32[1,128], index: 5, kind: input, shape index: {}]   ;;  %s1807_s6 = inlined_call_operand.hbm [shape: f32[8,128], index: 6, kind: output, shape index: {}]  }
   0x1   :  { %12 = vsyncpa [#allocation7], 0 }
   0x2   :  { %13 = vsyncpa [#allocation10], 0  ;;  %s32_s23 = sshll.u32 %s1802_s1, 4  ;;  %s33_s23 = int_to_ptr.hbm [resolvable:$true] %s32_s23 }
   0x3   :  { %14 = vsyncpa [#allocation5], 0  ;;  %s1453_s24 = smov [#allocation6]   ;;  %s56_s28 = sshll.u32 %s1804_s3, 4  ;;  %s57_s28 = int_to_ptr.hbm [resolvable:$true] %s56_s28 }
   0x4   :  { %s34_s25 = sshll.u32 %s1453_s24, 4  ;;  %s1454_s29 = smov 256   ;;  %s35_s25 = int_to_ptr.vmem [resolvable:$true] %s34_s25 }
   0x5   :  { %s1455_s30 = smov 16   ;;  %s1456_s7 = smov [#allocation9]  }
   0x6   :  { %40 = dma.hbm_to_vmem [thread:$0]  %s33_s23, 1024, %s35_s25, [#allocation7], %s1454_s29, %s1454_s29, %s1455_s30  }
   0x7   :  { %s58_s8 = sshll.u32 %s1456_s7, 4  ;;  %s19_s11 = sshll.u32 %s1801_s0, 4  ;;  %s59_s8 = int_to_ptr.vmem [resolvable:$true] %s58_s8  ;;  %s20_s11 = int_to_ptr.hbm [resolvable:$true] %s19_s11 }
   0x8   :  { %64 = dma.hbm_to_vmem [thread:$0]  %s57_s28, 2048, %s59_s8, [#allocation10], %s1454_s29, %s1454_s29, %s1455_s30  }
   0x9   :  { %s1457_s1 = smov [#allocation3]   ;;  %s46_s3 = sshll.u32 %s1803_s2, 4  ;;  %s47_s3 = int_to_ptr.hbm [resolvable:$true] %s46_s3 }
   0xa   :  { %s21_s12 = sshll.u32 %s1457_s1, 4  ;;  %s1458_s15 = smov 128   ;;  %s22_s12 = int_to_ptr.vmem [resolvable:$true] %s21_s12 }
   0xb   :  { %s1459_s16 = smov 8   ;;  %s1460_s17 = smov [#allocation8]  }
   0xc   :  { %27 = dma.hbm_to_vmem [thread:$0]  %s20_s11, 1024, %s22_s12, [#allocation4], %s1458_s15, %s1458_s15, %s1459_s16  }
   0xd   :  { %s48_s18 = sshll.u32 %s1460_s17, 4  ;;  %s69_s0 = sshll.u32 %s1805_s4, 4  ;;  %s49_s18 = int_to_ptr.vmem [resolvable:$true] %s48_s18  ;;  %s70_s0 = int_to_ptr.hbm [resolvable:$true] %s69_s0 }
   0xe   :  { %51 = dma.hbm_to_vmem [thread:$0]  %s47_s3, 32, %s49_s18, [#allocation7]  }
   0xf   :  { %s1461_s21 = smov [#allocation11]  }
  0x10   :  { %s71_s22 = sshll.u32 %s1461_s21, 4  ;;  %s72_s22 = int_to_ptr.vmem [resolvable:$true] %s71_s22 }
  0x11   :  { %77 = dma.hbm_to_vmem [thread:$0]  %s70_s0, 1024, %s72_s22, [#allocation10], %s1458_s15, %s1458_s15, %s1459_s16  }
  0x12   :  { %1445 = dma.done.wait [#allocation4], 1024  }
  0x13   :  { %1446 = vsyncadd [#allocation4], 4294966272 }
  0x14   :  { %1447 = dma.done.wait [#allocation7], 1056  }
  0x15   :  { %1448 = vsyncadd [#allocation7], 4294966240 }
  0x16   :  { %1449 = dma.done.wait [#allocation10], 3072  }
  0x17   :  { %1450 = vsyncadd [#allocation10], 4294964224  ;;  %vm147_vm0 = vcmask 1043456   ;;  %v1515_v0 = vld [vmem:[#allocation9 + $0x78] sm:$0xff]  ;;  %v1517_v1 = vld [vmem:[#allocation9 + $0x68] sm:$0xff]  ;;  %vm122_vm1 = vcmask 228352  }
  0x18   :  { %v114_v2 = vld [vmem:[#allocation6 + $0x30] sm:$0xf]  ;;  %302 = vmatpush.msra.mxu3 %v1515_v0  ;;  %v112_v3 = vld [vmem:[#allocation6 + $0x20] sm:$0xff]  ;;  %v1528_v8 = vld [vmem:[#allocation3 + $0x38] sm:$0xff]  ;;  %v1462_v23 = vmov 0.0   ;;  %s1463_s2 = smov 64  }
  0x19   :  { %1188 = vmatpush.msk.msra.mxu1 %vm147_vm0, %v114_v2  ;;  %v1521_v4 = vld [vmem:[#allocation9 + $0x58] sm:$0xff]  ;;  %v110_v5 = vld [vmem:[#allocation6 + $0x10] sm:$0xff]  ;;  %1139 = vmatpush.msk.msra.mxu0 %vm147_vm0, %v114_v2  ;;  %v1535_v12 = vld [vmem:[#allocation9 + $0x60] sm:$0xff]  ;;  %vm270_vm10 = vcmask 523264   ;;  %s1464_s24 = smov [#allocation12]   ;;  %s1127_s28 = sshll.u32 %s1807_s6, 4  ;;  %s1128_s28 = int_to_ptr.hbm [resolvable:$true] %s1127_s28 }
  0x1a   :  { %303 = vmatpush.msra.mxu3 %v1517_v1  ;;  %v1525_v6 = vld [vmem:[#allocation9 + $0x48] sm:$0xff]  ;;  %v108_v7 = vld [vmem:[#allocation6] sm:$0xff]  ;;  %v115_v10 = vld [vmem:[#allocation6 + $0x38] sm:$0xf]  ;;  %s1125_s25 = sshll.u32 %s1464_s24, 4  ;;  %s1126_s25 = int_to_ptr.vmem [resolvable:$true] %s1125_s25 }
  0x1b   :  { %1189 = vmatpush.msra.mxu1 %v112_v3  ;;  %167 = vmatpush.msra.mxu0 %v112_v3  ;;  %v1530_v9 = vld [vmem:[#allocation9 + $0x38] sm:$0xff]  ;;  %v1532_v11 = vld [vmem:[#allocation9 + $0x70] sm:$0xff]  ;;  %v1537_v13 = vld [vmem:[#allocation9 + $0x28] sm:$0xff] }
  0x1c   :  { %304 = vmatpush.msra.mxu3 %v1521_v4  ;;  %v113_v14 = vld [vmem:[#allocation6 + $0x28] sm:$0xff]  ;;  %282 = vmatpush.msra.mxu2 %v1532_v11  ;;  %v1544_v15 = vld [vmem:[#allocation9 + $0x50] sm:$0xff]  ;;  %v1546_v16 = vld [vmem:[#allocation9 + $0x18] sm:$0xff] }
  0x1d   :  { %1190 = vmatpush.msra.mxu1 %v110_v5  ;;  %168 = vmatpush.msra.mxu0 %v110_v5  ;;  %v111_v17 = vld [vmem:[#allocation6 + $0x18] sm:$0xff]  ;;  %v100_v18 = vld [vmem:[#allocation3] sm:$0xff]  ;;  %v1552_v20 = vld [vmem:[#allocation9 + $0x8] sm:$0xff] }
  0x1e   :  { %305 = vmatpush.msra.mxu3 %v1525_v6  ;;  %283 = vmatpush.msra.mxu2 %v1535_v12  ;;  %v1550_v19 = vld [vmem:[#allocation9 + $0x40] sm:$0xff]  ;;  %v1558_v22 = vld [vmem:[#allocation9 + $0x30] sm:$0xff]  ;;  %v116_v28 = vld [vmem:[#allocation8] sm:$0x3] }
  0x1f   :  { %1191 = vmatpush.msra.mxu1 %v108_v7  ;;  %169 = vmatpush.msra.mxu0 %v108_v7  ;;  %v109_v21 = vld [vmem:[#allocation6 + $0x8] sm:$0xff]  ;;  %v1567_v25 = vld [vmem:[#allocation9 + $0x10] sm:$0xff]  ;;  %v1638_v29 = vperm.slane %v116_v28, 1  ;;  %v1642_v36 = vperm.slane %v116_v28, 0 }
  0x20   :  { %1147 = vmatmul.msk.f32.vlgmr.msra.gmra.mxu1 %vm122_vm1, %v1528_v8  ;;  %306 = vmatpush.msra.mxu3 %v1530_v9  ;;  %v1563_v24 = vld [vmem:[#allocation9 + $0x20] sm:$0xff] }
  0x21   :  { %1148 = vmatpush.msk.msrb.mxu1 %vm147_vm0, %v115_v10  ;;  %284 = vmatpush.msra.mxu2 %v1544_v15  ;;  %v1573_v26 = vld [vmem:[#allocation9] sm:$0xff] }
  0x22   :  { %307 = vmatpush.msra.mxu3 %v1537_v13  ;;  %1140 = vmatmul.msk.f32.vlgmr.msra.gmra.mxu0 %vm122_vm1, %v100_v18  ;;  %v101_v62 = vld [vmem:[#allocation3 + $0x8] sm:$0xff] }
  0x23   :  { %208 = vmatpush.msrb.mxu1 %v113_v14  ;;  %285 = vmatpush.msra.mxu2 %v1550_v19 }
  0x24   :  { %308 = vmatpush.msra.mxu3 %v1546_v16  ;;  %690 = vmatpush.msrb.mxu0 %v1532_v11 }
  0x25   :  { %209 = vmatpush.msrb.mxu1 %v111_v17  ;;  %286 = vmatpush.msra.mxu2 %v1558_v22 }
  0x26   :  { %309 = vmatpush.msra.mxu3 %v1552_v20  ;;  %691 = vmatpush.msrb.mxu0 %v1535_v12 }
  0x27   :  { %210 = vmatpush.msrb.mxu1 %v109_v21  ;;  %310 = vmatmul.f32.vlgmr.msra.gmra.mxu3 %v1462_v23 }
  0x28   :  { %1149 = vmatmul.msk.f32.vlgmr.msrb.gmra.mxu1 %vm122_vm1, %v100_v18  ;;  %404 = vmatpush.msrb.mxu3 %v1515_v0 }
  0x29   :  { %710 = vmatpush.msra.mxu1 %v1515_v0  ;;  %287 = vmatpush.msra.mxu2 %v1563_v24 }
  0x2a   :  { %405 = vmatpush.msrb.mxu3 %v1517_v1  ;;  %692 = vmatpush.msrb.mxu0 %v1544_v15 }
  0x2b   :  { %711 = vmatpush.msra.mxu1 %v1517_v1  ;;  %288 = vmatpush.msra.mxu2 %v1567_v25 }
  0x2c   :  { %406 = vmatpush.msrb.mxu3 %v1521_v4  ;;  %693 = vmatpush.msrb.mxu0 %v1550_v19 }
  0x2d   :  { %712 = vmatpush.msra.mxu1 %v1521_v4  ;;  %289 = vmatpush.msra.mxu2 %v1573_v26 }
  0x2e   :  { %407 = vmatpush.msrb.mxu3 %v1525_v6  ;;  %290 = vmatmul.f32.vlgmr.msra.gmra.mxu2 %v1462_v23 }
  0x2f   :  { %713 = vmatpush.msra.mxu1 %v1525_v6  ;;  %384 = vmatpush.msrb.mxu2 %v1532_v11 }
  0x30   :  { %408 = vmatpush.msrb.mxu3 %v1530_v9  ;;  %694 = vmatpush.msrb.mxu0 %v1558_v22 }
  0x31   :  { %714 = vmatpush.msra.mxu1 %v1530_v9  ;;  %385 = vmatpush.msrb.mxu2 %v1535_v12 }
  0x32   :  { %409 = vmatpush.msrb.mxu3 %v1537_v13  ;;  %695 = vmatpush.msrb.mxu0 %v1563_v24 }
  0x33   :  { %715 = vmatpush.msra.mxu1 %v1537_v13  ;;  %386 = vmatpush.msrb.mxu2 %v1544_v15 }
  0x34   :  { %410 = vmatpush.msrb.mxu3 %v1546_v16  ;;  %696 = vmatpush.msrb.mxu0 %v1567_v25 }
  0x35   :  { %716 = vmatpush.msra.mxu1 %v1546_v16  ;;  %387 = vmatpush.msrb.mxu2 %v1550_v19 }
  0x36   :  { %411 = vmatpush.msrb.mxu3 %v1552_v20  ;;  %697 = vmatpush.msrb.mxu0 %v1573_v26 }
  0x37   :  { %717 = vmatpush.msra.mxu1 %v1552_v20  ;;  %388 = vmatpush.msrb.mxu2 %v1558_v22 }
  0x38   :  { %506 = vmatpush.msra.mxu3 %v1515_v0  ;;  %894 = vmatpush.msra.mxu0 %v1532_v11 }
  0x39   :  { %389 = vmatpush.msrb.mxu2 %v1563_v24  ;;  %914 = vmatpush.msrb.mxu1 %v1515_v0 }
  0x3a   :  { %507 = vmatpush.msra.mxu3 %v1517_v1  ;;  %895 = vmatpush.msra.mxu0 %v1535_v12 }
  0x3b   :  { %390 = vmatpush.msrb.mxu2 %v1567_v25  ;;  %915 = vmatpush.msrb.mxu1 %v1517_v1 }
  0x3c   :  { %508 = vmatpush.msra.mxu3 %v1521_v4  ;;  %896 = vmatpush.msra.mxu0 %v1544_v15 }
  0x3d   :  { %391 = vmatpush.msrb.mxu2 %v1573_v26  ;;  %916 = vmatpush.msrb.mxu1 %v1521_v4 }
  0x3e   :  { %509 = vmatpush.msra.mxu3 %v1525_v6  ;;  %897 = vmatpush.msra.mxu0 %v1550_v19 }
  0x3f   :  { %486 = vmatpush.msra.mxu2 %v1532_v11  ;;  %917 = vmatpush.msrb.mxu1 %v1525_v6 }
  0x40   :  { %510 = vmatpush.msra.mxu3 %v1530_v9  ;;  %898 = vmatpush.msra.mxu0 %v1558_v22 }
  0x41   :  { %487 = vmatpush.msra.mxu2 %v1535_v12  ;;  %918 = vmatpush.msrb.mxu1 %v1530_v9 }
  0x42   :  { %511 = vmatpush.msra.mxu3 %v1537_v13  ;;  %899 = vmatpush.msra.mxu0 %v1563_v24 }
  0x43   :  { %488 = vmatpush.msra.mxu2 %v1544_v15  ;;  %919 = vmatpush.msrb.mxu1 %v1537_v13 }
  0x44   :  { %512 = vmatpush.msra.mxu3 %v1546_v16  ;;  %900 = vmatpush.msra.mxu0 %v1567_v25 }
  0x45   :  { %489 = vmatpush.msra.mxu2 %v1550_v19  ;;  %920 = vmatpush.msrb.mxu1 %v1546_v16 }
  0x46   :  { %513 = vmatpush.msra.mxu3 %v1552_v20  ;;  %901 = vmatpush.msra.mxu0 %v1573_v26 }
  0x47   :  { %490 = vmatpush.msra.mxu2 %v1558_v22  ;;  %921 = vmatpush.msrb.mxu1 %v1552_v20 }
  0x48   :  { %1141 = vmatmul.msk.f32.gmra.mxu0 %vm122_vm1, %v101_v62  ;;  %1150 = vmatmul.msk.f32.gmra.mxu1 %vm122_vm1, %v101_v62 }
  0x49   :  { %491 = vmatpush.msra.mxu2 %v1563_v24 }
  0x4b   :  { %492 = vmatpush.msra.mxu2 %v1567_v25 }
  0x4d   :  { %493 = vmatpush.msra.mxu2 %v1573_v26 }
  0x9d   :  { %v1636_v27 = vpop.f32.mrf.mxu1 }
  0x9f   :  { %v171_v35 = vpop.f32.mrf.mxu0 }
  0xa0   :  { %v172_v37 = vadd.f32 %v171_v35, %v1642_v36 }
  0xa5   :  { %v212_v30 = vpop.f32.mrf.mxu1 }
  0xa6   :  { %v213_v31 = vadd.f32 %v212_v30, %v1638_v29 }
  0xaa   :  { %v311_v32 = vpop.f32.mrf.mxu3 }
  0xab   :  { %v312_v33 = vadd.f32 %v311_v32, %v213_v31 }
  0xad   :  { %1205 = vtanh.f32 %v312_v33  ;;  %v1158_v59 = vmul.f32 -1.442695, %v312_v33 }
  0xb1   :  { %v291_v38 = vpop.f32.mrf.mxu2 }
  0xb2   :  { %v292_v39 = vadd.f32 %v291_v38, %v172_v37 }
  0xb3   :  { %v1206_v34 = vpop.eup %1205 }
  0xb4   :  { %355 = vrot.lane.b32.xlu0 %v1206_v34, %s1463_s2  ;;  %v1157_v40 = vmul.f32 -1.442695, %v292_v39 }
  0xb6   :  { %1207 = vpow2.f32 %v1157_v40 }
  0xbc   :  { %v1208_v41 = vpop.eup %1207 }
  0xbd   :  { %v320_v42 = vadd.f32 1.0, %v1208_v41 }
  0xbf   :  { %1209 = vrcp.f32 %v320_v42  ;;  %vm327_vm2 = vweird.f32 %v320_v42  ;;  %v333_v47 = vand.u32 2147483648, %v320_v42  ;;  %v331_v49 = vand.u32 2147483647, %v320_v42 }
  0xc1   :  { %v334_v50 = vor.u32 1.1754944e-38, %v333_v47  ;;  %vm332_vm5 = vcmp.eq.f32.partialorder %v331_v49, 8.507059e+37 }
  0xc5   :  { %v1210_v43 = vpop.eup %1209  ;;  %v215_v30 = vpop.f32.mrf.mxu1 }
  0xc6   :  { %v323_v44 = vmul.f32 %v1210_v43, %v320_v42  ;;  %vm328_vm3 = vweird.f32 %v1210_v43  ;;  %v216_v31 = vadd.f32 %v215_v30, %v1638_v29  ;;  %v174_v35 = vpop.f32.mrf.mxu0 }
  0xc7   :  { %vm329_vm4 = vmor %vm327_vm2, %vm328_vm3  ;;  %v175_v37 = vadd.f32 %v174_v35, %v1642_v36 }
  0xc8   :  { %v324_v45 = vsub.f32 1.0, %v323_v44 }
  0xca   :  { %v325_v46 = vmul.f32 %v1210_v43, %v324_v45 }
  0xcc   :  { %v326_v48 = vadd.f32 %v1210_v43, %v325_v46 }
  0xce   :  { %v330_v51 = vsel %vm329_vm4, %v1210_v43, %v326_v48 }
  0xcf   :  { %v335_v53 = vsel %vm332_vm5, %v334_v50, %v330_v51 }
  0xd0   :  { %v353_v55 = vmul.f32 0.0, %v335_v53 }
 0x126   :  { %v356_v52 = vpop.permute.xlu0 %355 }
 0x127   :  { %v358_v54 = vmul.f32 %v356_v52, %v335_v53 }
 0x129   :  { %360 = vrot.lane.b32.xlu0 %v358_v54, %s1463_s2 }
 0x19b   :  { %v361_v56 = vpop.permute.xlu0 %360 }
 0x19c   :  { %v1646_v57 = vadd.f32 %v361_v56, %v353_v55 }
 0x19e   :  { %1211 = vtanh.f32 %v1646_v57 }
 0x19f   :  { %1213 = vpow2.f32 %v1158_v59 }
 0x1a4   :  { %v1212_v58 = vpop.eup %1211 }
 0x1a5   :  { %366 = vrot.lane.b32.xlu1 %v1212_v58, %s1463_s2  ;;  %v1214_v60 = vpop.eup %1213 }
 0x1a6   :  { %v321_v61 = vadd.f32 1.0, %v1214_v60 }
 0x1a8   :  { %1215 = vrcp.f32 %v321_v61  ;;  %v348_v10 = vand.u32 2147483648, %v321_v61  ;;  %vm342_vm7 = vweird.f32 %v321_v61  ;;  %v346_v14 = vand.u32 2147483647, %v321_v61 }
 0x1aa   :  { %v349_v18 = vor.u32 1.1754944e-38, %v348_v10  ;;  %vm347_vm9 = vcmp.eq.f32.partialorder %v346_v14, 8.507059e+37 }
 0x1ae   :  { %v1216_v63 = vpop.eup %1215 }
 0x1af   :  { %v338_v2 = vmul.f32 %v1216_v63, %v321_v61  ;;  %vm343_vm6 = vweird.f32 %v1216_v63 }
 0x1b0   :  { %vm344_vm8 = vmor %vm342_vm7, %vm343_vm6 }
 0x1b1   :  { %v339_v3 = vsub.f32 1.0, %v338_v2 }
 0x1b3   :  { %v340_v5 = vmul.f32 %v1216_v63, %v339_v3 }
 0x1b5   :  { %v341_v7 = vadd.f32 %v1216_v63, %v340_v5 }
 0x1b7   :  { %v345_v17 = vsel %vm344_vm8, %v1216_v63, %v341_v7  ;;  %v102_v63 = vld [vmem:[#allocation3 + $0x10] sm:$0xff] }
 0x1b8   :  { %v350_v21 = vsel %vm347_vm9, %v349_v18, %v345_v17  ;;  %1142 = vmatmul.msk.f32.gmra.mxu0 %vm122_vm1, %v102_v63  ;;  %1151 = vmatmul.msk.f32.gmra.mxu1 %vm122_vm1, %v102_v63 }
 0x217   :  { %v367_v23 = vpop.permute.xlu1 %366 }
 0x218   :  { %v369_v28 = vmul.f32 %v367_v23, %v350_v21 }
 0x21a   :  { %1159 = vmatmul.msk.f32.vlgmr.msrb.gmra.mxu2 %vm270_vm10, %v369_v28  ;;  %1160 = vmatmul.msk.f32.vlgmr.msrb.gmra.mxu3 %vm270_vm10, %v369_v28 }
 0x21b   :  { %588 = vmatpush.msrb.mxu2 %v1532_v11  ;;  %608 = vmatpush.msrb.mxu3 %v1515_v0 }
 0x21d   :  { %589 = vmatpush.msrb.mxu2 %v1535_v12  ;;  %609 = vmatpush.msrb.mxu3 %v1517_v1 }
 0x21f   :  { %590 = vmatpush.msrb.mxu2 %v1544_v15  ;;  %610 = vmatpush.msrb.mxu3 %v1521_v4 }
 0x221   :  { %591 = vmatpush.msrb.mxu2 %v1550_v19  ;;  %611 = vmatpush.msrb.mxu3 %v1525_v6 }
 0x223   :  { %592 = vmatpush.msrb.mxu2 %v1558_v22  ;;  %612 = vmatpush.msrb.mxu3 %v1530_v9 }
 0x225   :  { %593 = vmatpush.msrb.mxu2 %v1563_v24  ;;  %613 = vmatpush.msrb.mxu3 %v1537_v13 }
 0x227   :  { %594 = vmatpush.msrb.mxu2 %v1567_v25  ;;  %614 = vmatpush.msrb.mxu3 %v1546_v16 }
 0x229   :  { %595 = vmatpush.msrb.mxu2 %v1573_v26  ;;  %615 = vmatpush.msrb.mxu3 %v1552_v20 }
 0x235   :  { %v218_v30 = vpop.f32.mrf.mxu1  ;;  %v177_v35 = vpop.f32.mrf.mxu0 }
 0x29d   :  { %v413_v32 = vpop.f32.mrf.mxu3  ;;  %v393_v38 = vpop.f32.mrf.mxu2 }
 0x29e   :  { %v414_v33 = vadd.f32 %v413_v32, %v216_v31  ;;  %v394_v39 = vadd.f32 %v393_v38, %v175_v37  ;;  %v219_v31 = vadd.f32 %v218_v30, %v1638_v29  ;;  %v178_v37 = vadd.f32 %v177_v35, %v1642_v36 }
 0x2a0   :  { %1217 = vtanh.f32 %v414_v33  ;;  %v1161_v40 = vmul.f32 -1.442695, %v394_v39  ;;  %v1162_v60 = vmul.f32 -1.442695, %v414_v33 }
 0x2a2   :  { %1219 = vpow2.f32 %v1161_v40 }
 0x2a6   :  { %v1218_v34 = vpop.eup %1217 }
 0x2a7   :  { %457 = vrot.lane.b32.xlu1 %v1218_v34, %s1463_s2 }
 0x2a8   :  { %v1220_v41 = vpop.eup %1219 }
 0x2a9   :  { %v422_v42 = vadd.f32 1.0, %v1220_v41 }
 0x2ab   :  { %1221 = vrcp.f32 %v422_v42  ;;  %v435_v48 = vand.u32 2147483648, %v422_v42  ;;  %vm429_vm12 = vweird.f32 %v422_v42  ;;  %v433_v49 = vand.u32 2147483647, %v422_v42 }
 0x2ad   :  { %v436_v51 = vor.u32 1.1754944e-38, %v435_v48  ;;  %vm434_vm14 = vcmp.eq.f32.partialorder %v433_v49, 8.507059e+37 }
 0x2b1   :  { %v1222_v43 = vpop.eup %1221 }
 0x2b2   :  { %v425_v44 = vmul.f32 %v1222_v43, %v422_v42  ;;  %vm430_vm11 = vweird.f32 %v1222_v43 }
 0x2b3   :  { %vm431_vm13 = vmor %vm429_vm12, %vm430_vm11 }
 0x2b4   :  { %v426_v45 = vsub.f32 1.0, %v425_v44 }
 0x2b6   :  { %v427_v46 = vmul.f32 %v1222_v43, %v426_v45 }
 0x2b8   :  { %v428_v47 = vadd.f32 %v1222_v43, %v427_v46 }
 0x2ba   :  { %v432_v50 = vsel %vm431_vm13, %v1222_v43, %v428_v47 }
 0x2bb   :  { %v437_v53 = vsel %vm434_vm14, %v436_v51, %v432_v50 }
 0x2bc   :  { %v455_v55 = vmul.f32 %v437_v53, %v1646_v57 }
 0x319   :  { %v458_v52 = vpop.permute.xlu1 %457 }
 0x31a   :  { %v460_v54 = vmul.f32 %v458_v52, %v437_v53 }
 0x31c   :  { %462 = vrot.lane.b32.xlu2 %v460_v54, %s1463_s2 }
 0x376   :  { %v463_v56 = vpop.permute.xlu2 %462 }
 0x377   :  { %v1675_v58 = vadd.f32 %v463_v56, %v455_v55 }
 0x379   :  { %1223 = vtanh.f32 %v1675_v58 }
 0x37a   :  { %1225 = vpow2.f32 %v1162_v60 }
 0x37f   :  { %v1224_v59 = vpop.eup %1223 }
 0x380   :  { %468 = vrot.lane.b32.xlu2 %v1224_v59, %s1463_s2  ;;  %v1226_v61 = vpop.eup %1225 }
 0x381   :  { %v423_v62 = vadd.f32 1.0, %v1226_v61 }
 0x383   :  { %1227 = vrcp.f32 %v423_v62  ;;  %v450_v10 = vand.u32 2147483648, %v423_v62  ;;  %vm444_vm0 = vweird.f32 %v423_v62  ;;  %v448_v14 = vand.u32 2147483647, %v423_v62 }
 0x385   :  { %v451_v18 = vor.u32 1.1754944e-38, %v450_v10  ;;  %vm449_vm3 = vcmp.eq.f32.partialorder %v448_v14, 8.507059e+37 }
 0x389   :  { %v1228_v2 = vpop.eup %1227 }
 0x38a   :  { %v440_v57 = vmul.f32 %v1228_v2, %v423_v62  ;;  %vm445_vm15 = vweird.f32 %v1228_v2 }
 0x38b   :  { %vm446_vm2 = vmor %vm444_vm0, %vm445_vm15 }
 0x38c   :  { %v441_v3 = vsub.f32 1.0, %v440_v57 }
 0x38e   :  { %v442_v5 = vmul.f32 %v1228_v2, %v441_v3 }
 0x390   :  { %v443_v7 = vadd.f32 %v1228_v2, %v442_v5 }
 0x392   :  { %v447_v17 = vsel %vm446_vm2, %v1228_v2, %v443_v7  ;;  %v103_v2 = vld [vmem:[#allocation3 + $0x18] sm:$0xff] }
 0x393   :  { %v452_v21 = vsel %vm449_vm3, %v451_v18, %v447_v17  ;;  %1143 = vmatmul.msk.f32.gmra.mxu0 %vm122_vm1, %v103_v2  ;;  %1152 = vmatmul.msk.f32.gmra.mxu1 %vm122_vm1, %v103_v2 }
 0x3da   :  { %v469_v23 = vpop.permute.xlu2 %468 }
 0x3db   :  { %v471_v28 = vmul.f32 %v469_v23, %v452_v21 }
 0x3dd   :  { %1163 = vmatmul.msk.f32.vlgmr.msra.gmra.mxu2 %vm270_vm10, %v471_v28  ;;  %1164 = vmatmul.msk.f32.vlgmr.msra.gmra.mxu3 %vm270_vm10, %v471_v28 }
 0x3de   :  { %792 = vmatpush.msra.mxu2 %v1532_v11  ;;  %812 = vmatpush.msra.mxu3 %v1515_v0 }
 0x3e0   :  { %793 = vmatpush.msra.mxu2 %v1535_v12  ;;  %813 = vmatpush.msra.mxu3 %v1517_v1 }
 0x3e2   :  { %794 = vmatpush.msra.mxu2 %v1544_v15  ;;  %814 = vmatpush.msra.mxu3 %v1521_v4 }
 0x3e4   :  { %795 = vmatpush.msra.mxu2 %v1550_v19  ;;  %815 = vmatpush.msra.mxu3 %v1525_v6 }
 0x3e6   :  { %796 = vmatpush.msra.mxu2 %v1558_v22  ;;  %816 = vmatpush.msra.mxu3 %v1530_v9 }
 0x3e8   :  { %797 = vmatpush.msra.mxu2 %v1563_v24  ;;  %817 = vmatpush.msra.mxu3 %v1537_v13 }
 0x3ea   :  { %798 = vmatpush.msra.mxu2 %v1567_v25  ;;  %818 = vmatpush.msra.mxu3 %v1546_v16 }
 0x3ec   :  { %799 = vmatpush.msra.mxu2 %v1573_v26  ;;  %819 = vmatpush.msra.mxu3 %v1552_v20 }
 0x460   :  { %v515_v32 = vpop.f32.mrf.mxu3  ;;  %v495_v38 = vpop.f32.mrf.mxu2 }
 0x461   :  { %v516_v33 = vadd.f32 %v515_v32, %v219_v31  ;;  %v496_v39 = vadd.f32 %v495_v38, %v178_v37 }
 0x463   :  { %1229 = vtanh.f32 %v516_v33  ;;  %v1165_v40 = vmul.f32 -1.442695, %v496_v39  ;;  %v1166_v61 = vmul.f32 -1.442695, %v516_v33  ;;  %v104_v39 = vld [vmem:[#allocation3 + $0x20] sm:$0xff] }
 0x464   :  { %1153 = vmatmul.msk.f32.gmra.mxu1 %vm122_vm1, %v104_v39  ;;  %1144 = vmatmul.msk.f32.gmra.mxu0 %vm122_vm1, %v104_v39 }
 0x465   :  { %1231 = vpow2.f32 %v1165_v40  ;;  %v105_v40 = vld [vmem:[#allocation3 + $0x28] sm:$0xff] }
 0x469   :  { %v1230_v34 = vpop.eup %1229 }
 0x46a   :  { %559 = vrot.lane.b32.xlu0 %v1230_v34, %s1463_s2 }
 0x46b   :  { %v1232_v41 = vpop.eup %1231 }
 0x46c   :  { %v524_v42 = vadd.f32 1.0, %v1232_v41  ;;  %1154 = vmatmul.msk.f32.gmra.mxu1 %vm122_vm1, %v105_v40  ;;  %1145 = vmatmul.msk.f32.gmra.mxu0 %vm122_vm1, %v105_v40  ;;  %v106_v41 = vld [vmem:[#allocation3 + $0x30] sm:$0xff] }
 0x46e   :  { %1233 = vrcp.f32 %v524_v42  ;;  %v537_v48 = vand.u32 2147483648, %v524_v42  ;;  %vm531_vm5 = vweird.f32 %v524_v42  ;;  %v535_v49 = vand.u32 2147483647, %v524_v42 }
 0x470   :  { %v538_v51 = vor.u32 1.1754944e-38, %v537_v48  ;;  %vm536_vm7 = vcmp.eq.f32.partialorder %v535_v49, 8.507059e+37 }
 0x474   :  { %v1234_v43 = vpop.eup %1233  ;;  %1155 = vmatmul.msk.f32.gmra.mxu1 %vm122_vm1, %v106_v41  ;;  %1146 = vmatmul.msk.f32.gmra.mxu0 %vm122_vm1, %v106_v41 }
 0x475   :  { %v527_v44 = vmul.f32 %v1234_v43, %v524_v42  ;;  %vm532_vm4 = vweird.f32 %v1234_v43 }
 0x476   :  { %vm533_vm6 = vmor %vm531_vm5, %vm532_vm4 }
 0x477   :  { %v528_v45 = vsub.f32 1.0, %v527_v44 }
 0x479   :  { %v529_v46 = vmul.f32 %v1234_v43, %v528_v45 }
 0x47b   :  { %v530_v47 = vadd.f32 %v1234_v43, %v529_v46 }
 0x47c   :  { %1156 = vmatmul.msk.f32.gmra.mxu1 %vm122_vm1, %v1528_v8 }
 0x47d   :  { %v534_v50 = vsel %vm533_vm6, %v1234_v43, %v530_v47 }
 0x47e   :  { %v539_v53 = vsel %vm536_vm7, %v538_v51, %v534_v50 }
 0x47f   :  { %v557_v55 = vmul.f32 %v539_v53, %v1675_v58 }
 0x4dc   :  { %v560_v52 = vpop.permute.xlu0 %559 }
 0x4dd   :  { %v562_v54 = vmul.f32 %v560_v52, %v539_v53 }
 0x4df   :  { %564 = vrot.lane.b32.xlu1 %v562_v54, %s1463_s2 }
 0x551   :  { %v565_v56 = vpop.permute.xlu1 %564 }
 0x552   :  { %v1704_v59 = vadd.f32 %v565_v56, %v557_v55 }
 0x554   :  { %1235 = vtanh.f32 %v1704_v59 }
 0x555   :  { %1237 = vpow2.f32 %v1166_v61 }
 0x55a   :  { %v1236_v60 = vpop.eup %1235 }
 0x55b   :  { %570 = vrot.lane.b32.xlu2 %v1236_v60, %s1463_s2  ;;  %v1238_v62 = vpop.eup %1237 }
 0x55c   :  { %v525_v63 = vadd.f32 1.0, %v1238_v62 }
 0x55e   :  { %1239 = vrcp.f32 %v525_v63  ;;  %v552_v10 = vand.u32 2147483648, %v525_v63  ;;  %vm546_vm9 = vweird.f32 %v525_v63  ;;  %v550_v14 = vand.u32 2147483647, %v525_v63 }
 0x560   :  { %v553_v18 = vor.u32 1.1754944e-38, %v552_v10  ;;  %vm551_vm12 = vcmp.eq.f32.partialorder %v550_v14, 8.507059e+37 }
 0x564   :  { %v1240_v57 = vpop.eup %1239 }
 0x565   :  { %v542_v58 = vmul.f32 %v1240_v57, %v525_v63  ;;  %vm547_vm8 = vweird.f32 %v1240_v57 }
 0x566   :  { %vm548_vm11 = vmor %vm546_vm9, %vm547_vm8 }
 0x567   :  { %v543_v3 = vsub.f32 1.0, %v542_v58 }
 0x569   :  { %v544_v5 = vmul.f32 %v1240_v57, %v543_v3 }
 0x56b   :  { %v545_v7 = vadd.f32 %v1240_v57, %v544_v5 }
 0x56d   :  { %v549_v17 = vsel %vm548_vm11, %v1240_v57, %v545_v7 }
 0x56e   :  { %v554_v21 = vsel %vm551_vm12, %v553_v18, %v549_v17 }
 0x5b5   :  { %v571_v23 = vpop.permute.xlu2 %570 }
 0x5b6   :  { %v573_v28 = vmul.f32 %v571_v23, %v554_v21 }
 0x5b8   :  { %1167 = vmatmul.msk.f32.vlgmr.msrb.gmra.mxu2 %vm270_vm10, %v573_v28  ;;  %1168 = vmatmul.msk.f32.vlgmr.msrb.gmra.mxu3 %vm270_vm10, %v573_v28 }
 0x5b9   :  { %996 = vmatpush.msrb.mxu2 %v1532_v11  ;;  %1016 = vmatpush.msrb.mxu3 %v1515_v0  ;;  %v221_v0 = vpop.f32.mrf.mxu1 }
 0x5bb   :  { %997 = vmatpush.msrb.mxu2 %v1535_v12  ;;  %1017 = vmatpush.msrb.mxu3 %v1517_v1  ;;  %v222_v1 = vadd.f32 %v221_v0, %v1638_v29 }
 0x5bd   :  { %998 = vmatpush.msrb.mxu2 %v1544_v15  ;;  %1018 = vmatpush.msrb.mxu3 %v1521_v4 }
 0x5bf   :  { %999 = vmatpush.msrb.mxu2 %v1550_v19  ;;  %1019 = vmatpush.msrb.mxu3 %v1525_v6 }
 0x5c1   :  { %1000 = vmatpush.msrb.mxu2 %v1558_v22  ;;  %1020 = vmatpush.msrb.mxu3 %v1530_v9  ;;  %v180_v9 = vpop.f32.mrf.mxu0  ;;  %v224_v62 = vpop.f32.mrf.mxu1 }
 0x5c2   :  { %v181_v12 = vadd.f32 %v180_v9, %v1642_v36  ;;  %v225_v58 = vadd.f32 %v224_v62, %v1638_v29 }
 0x5c3   :  { %1001 = vmatpush.msrb.mxu2 %v1563_v24  ;;  %1021 = vmatpush.msrb.mxu3 %v1537_v13 }
 0x5c5   :  { %1002 = vmatpush.msrb.mxu2 %v1567_v25  ;;  %1022 = vmatpush.msrb.mxu3 %v1546_v16 }
 0x5c7   :  { %1003 = vmatpush.msrb.mxu2 %v1573_v26  ;;  %1023 = vmatpush.msrb.mxu3 %v1552_v20 }
 0x5c9   :  { %v1747_v63 = vpop.f32.mrf.mxu1  ;;  %v183_v10 = vpop.f32.mrf.mxu0 }
 0x5ca   :  { %v184_v18 = vadd.f32 %v183_v10, %v1642_v36 }
 0x5d1   :  { %v1749_v2 = vpop.f32.mrf.mxu1  ;;  %v1755_v14 = vpop.f32.mrf.mxu0 }
 0x5d9   :  { %v1751_v57 = vpop.f32.mrf.mxu1  ;;  %v1757_v17 = vpop.f32.mrf.mxu0 }
 0x63b   :  { %v617_v4 = vpop.f32.mrf.mxu3  ;;  %v597_v13 = vpop.f32.mrf.mxu2 }
 0x63c   :  { %v618_v6 = vadd.f32 %v617_v4, %v222_v1  ;;  %v598_v15 = vadd.f32 %v597_v13, %v181_v12 }
 0x63e   :  { %1241 = vtanh.f32 %v618_v6  ;;  %v1169_v19 = vmul.f32 -1.442695, %v598_v15  ;;  %v1170_v46 = vmul.f32 -1.442695, %v618_v6 }
 0x640   :  { %1243 = vpow2.f32 %v1169_v19 }
 0x644   :  { %v1242_v11 = vpop.eup %1241 }
 0x645   :  { %661 = vrot.lane.b32.xlu0 %v1242_v11, %s1463_s2 }
 0x646   :  { %v1244_v16 = vpop.eup %1243 }
 0x647   :  { %v626_v22 = vadd.f32 1.0, %v1244_v16 }
 0x649   :  { %1245 = vrcp.f32 %v626_v22  ;;  %v639_v31 = vand.u32 2147483648, %v626_v22  ;;  %vm633_vm14 = vweird.f32 %v626_v22  ;;  %v637_v32 = vand.u32 2147483647, %v626_v22 }
 0x64b   :  { %v640_v34 = vor.u32 1.1754944e-38, %v639_v31  ;;  %vm638_vm0 = vcmp.eq.f32.partialorder %v637_v32, 8.507059e+37 }
 0x64f   :  { %v1246_v20 = vpop.eup %1245 }
 0x650   :  { %v629_v24 = vmul.f32 %v1246_v20, %v626_v22  ;;  %vm634_vm13 = vweird.f32 %v1246_v20 }
 0x651   :  { %vm635_vm15 = vmor %vm633_vm14, %vm634_vm13 }
 0x652   :  { %v630_v25 = vsub.f32 1.0, %v629_v24 }
 0x654   :  { %v631_v26 = vmul.f32 %v1246_v20, %v630_v25 }
 0x656   :  { %v632_v30 = vadd.f32 %v1246_v20, %v631_v26 }
 0x658   :  { %v636_v33 = vsel %vm635_vm15, %v1246_v20, %v632_v30 }
 0x659   :  { %v641_v37 = vsel %vm638_vm0, %v640_v34, %v636_v33 }
 0x65a   :  { %v659_v42 = vmul.f32 %v641_v37, %v1704_v59 }
 0x6b7   :  { %v662_v35 = vpop.permute.xlu0 %661 }
 0x6b8   :  { %v664_v38 = vmul.f32 %v662_v35, %v641_v37 }
 0x6ba   :  { %666 = vrot.lane.b32.xlu1 %v664_v38, %s1463_s2 }
 0x72c   :  { %v667_v43 = vpop.permute.xlu1 %666 }
 0x72d   :  { %v1739_v44 = vadd.f32 %v667_v43, %v659_v42 }
 0x72f   :  { %1247 = vtanh.f32 %v1739_v44 }
 0x730   :  { %1249 = vpow2.f32 %v1170_v46 }
 0x735   :  { %v1248_v45 = vpop.eup %1247 }
 0x736   :  { %672 = vrot.lane.b32.xlu2 %v1248_v45, %s1463_s2  ;;  %v1250_v47 = vpop.eup %1249 }
 0x737   :  { %v627_v48 = vadd.f32 1.0, %v1250_v47 }
 0x739   :  { %1251 = vrcp.f32 %v627_v48  ;;  %v654_v54 = vand.u32 2147483648, %v627_v48  ;;  %vm648_vm3 = vweird.f32 %v627_v48  ;;  %v652_v55 = vand.u32 2147483647, %v627_v48 }
 0x73b   :  { %v655_v8 = vor.u32 1.1754944e-38, %v654_v54  ;;  %vm653_vm1 = vcmp.eq.f32.partialorder %v652_v55, 8.507059e+37 }
 0x73f   :  { %v1252_v49 = vpop.eup %1251 }
 0x740   :  { %v644_v50 = vmul.f32 %v1252_v49, %v627_v48  ;;  %vm649_vm2 = vweird.f32 %v1252_v49  ;;  %v228_v48 = vadd.f32 %v1747_v63, %v1638_v29 }
 0x741   :  { %vm650_vm4 = vmor %vm648_vm3, %vm649_vm2 }
 0x742   :  { %v645_v51 = vsub.f32 1.0, %v644_v50 }
 0x744   :  { %v646_v52 = vmul.f32 %v1252_v49, %v645_v51 }
 0x746   :  { %v647_v53 = vadd.f32 %v1252_v49, %v646_v52 }
 0x748   :  { %v651_v56 = vsel %vm650_vm4, %v1252_v49, %v647_v53  ;;  %v187_v53 = vadd.f32 %v1755_v14, %v1642_v36 }
 0x749   :  { %v656_v59 = vsel %vm653_vm1, %v655_v8, %v651_v56 }
 0x790   :  { %v673_v60 = vpop.permute.xlu2 %672 }
 0x791   :  { %v675_v61 = vmul.f32 %v673_v60, %v656_v59 }
 0x793   :  { %1171 = vmatmul.msk.f32.vlgmr.msrb.gmra.mxu0 %vm270_vm10, %v675_v61  ;;  %1172 = vmatmul.msk.f32.vlgmr.msra.gmra.mxu1 %vm270_vm10, %v675_v61 }
 0x810   :  { %v719_v3 = vpop.f32.mrf.mxu1  ;;  %v699_v21 = vpop.f32.mrf.mxu0 }
 0x811   :  { %v720_v5 = vadd.f32 %v719_v3, %v225_v58  ;;  %v700_v23 = vadd.f32 %v699_v21, %v184_v18 }
 0x813   :  { %1253 = vtanh.f32 %v720_v5  ;;  %v1173_v28 = vmul.f32 -1.442695, %v700_v23  ;;  %v1174_v32 = vmul.f32 -1.442695, %v720_v5 }
 0x815   :  { %1255 = vpow2.f32 %v1173_v28 }
 0x819   :  { %v1254_v7 = vpop.eup %1253 }
 0x81a   :  { %763 = vrot.lane.b32.xlu0 %v1254_v7, %s1463_s2 }
 0x81b   :  { %v1256_v0 = vpop.eup %1255 }
 0x81c   :  { %v728_v1 = vadd.f32 1.0, %v1256_v0 }
 0x81e   :  { %1257 = vrcp.f32 %v728_v1  ;;  %v741_v13 = vand.u32 2147483648, %v728_v1  ;;  %vm735_vm6 = vweird.f32 %v728_v1  ;;  %v739_v15 = vand.u32 2147483647, %v728_v1 }
 0x820   :  { %v742_v16 = vor.u32 1.1754944e-38, %v741_v13  ;;  %vm740_vm8 = vcmp.eq.f32.partialorder %v739_v15, 8.507059e+37 }
 0x824   :  { %v1258_v4 = vpop.eup %1257 }
 0x825   :  { %v731_v6 = vmul.f32 %v1258_v4, %v728_v1  ;;  %vm736_vm5 = vweird.f32 %v1258_v4 }
 0x826   :  { %vm737_vm7 = vmor %vm735_vm6, %vm736_vm5 }
 0x827   :  { %v732_v11 = vsub.f32 1.0, %v731_v6 }
 0x829   :  { %v733_v9 = vmul.f32 %v1258_v4, %v732_v11 }
 0x82b   :  { %v734_v12 = vadd.f32 %v1258_v4, %v733_v9 }
 0x82d   :  { %v738_v19 = vsel %vm737_vm7, %v1258_v4, %v734_v12 }
 0x82e   :  { %v743_v20 = vsel %vm740_vm8, %v742_v16, %v738_v19 }
 0x82f   :  { %v761_v25 = vmul.f32 %v743_v20, %v1739_v44 }
 0x88c   :  { %v764_v22 = vpop.permute.xlu0 %763 }
 0x88d   :  { %v766_v24 = vmul.f32 %v764_v22, %v743_v20 }
 0x88f   :  { %768 = vrot.lane.b32.xlu1 %v766_v24, %s1463_s2 }
 0x901   :  { %v769_v26 = vpop.permute.xlu1 %768 }
 0x902   :  { %v771_v30 = vadd.f32 %v769_v26, %v761_v25 }
 0x904   :  { %1259 = vtanh.f32 %v771_v30 }
 0x905   :  { %1261 = vpow2.f32 %v1174_v32 }
 0x90a   :  { %v1260_v31 = vpop.eup %1259 }
 0x90b   :  { %774 = vrot.lane.b32.xlu2 %v1260_v31, %s1463_s2  ;;  %v1262_v33 = vpop.eup %1261 }
 0x90c   :  { %v729_v34 = vadd.f32 1.0, %v1262_v33 }
 0x90e   :  { %1263 = vrcp.f32 %v729_v34  ;;  %v756_v41 = vand.u32 2147483648, %v729_v34  ;;  %vm750_vm11 = vweird.f32 %v729_v34  ;;  %v754_v42 = vand.u32 2147483647, %v729_v34 }
 0x910   :  { %v757_v44 = vor.u32 1.1754944e-38, %v756_v41  ;;  %vm755_vm13 = vcmp.eq.f32.partialorder %v754_v42, 8.507059e+37 }
 0x914   :  { %v1264_v35 = vpop.eup %1263 }
 0x915   :  { %v746_v37 = vmul.f32 %v1264_v35, %v729_v34  ;;  %vm751_vm9 = vweird.f32 %v1264_v35 }
 0x916   :  { %vm752_vm12 = vmor %vm750_vm11, %vm751_vm9 }
 0x917   :  { %v747_v38 = vsub.f32 1.0, %v746_v37 }
 0x919   :  { %v748_v39 = vmul.f32 %v1264_v35, %v747_v38 }
 0x91b   :  { %v749_v40 = vadd.f32 %v1264_v35, %v748_v39 }
 0x91d   :  { %v753_v43 = vsel %vm752_vm12, %v1264_v35, %v749_v40  ;;  %v190_v35 = vadd.f32 %v1757_v17, %v1642_v36 }
 0x91e   :  { %v758_v45 = vsel %vm755_vm13, %v757_v44, %v753_v43 }
 0x965   :  { %v775_v46 = vpop.permute.xlu2 %774 }
 0x966   :  { %v777_v47 = vmul.f32 %v775_v46, %v758_v45 }
 0x968   :  { %1175 = vmatmul.msk.f32.vlgmr.msra.gmra.mxu2 %vm270_vm10, %v777_v47  ;;  %1176 = vmatmul.msk.f32.vlgmr.msra.gmra.mxu3 %vm270_vm10, %v777_v47 }
 0x9eb   :  { %v821_v49 = vpop.f32.mrf.mxu3  ;;  %v801_v52 = vpop.f32.mrf.mxu2 }
 0x9ec   :  { %v822_v50 = vadd.f32 %v821_v49, %v228_v48  ;;  %v802_v54 = vadd.f32 %v801_v52, %v187_v53 }
 0x9ee   :  { %1265 = vtanh.f32 %v822_v50  ;;  %v1177_v55 = vmul.f32 -1.442695, %v802_v54  ;;  %v1178_v1 = vmul.f32 -1.442695, %v822_v50 }
 0x9f0   :  { %1267 = vpow2.f32 %v1177_v55 }
 0x9f4   :  { %v1266_v51 = vpop.eup %1265 }
 0x9f5   :  { %865 = vrot.lane.b32.xlu0 %v1266_v51, %s1463_s2 }
 0x9f6   :  { %v1268_v56 = vpop.eup %1267 }
 0x9f7   :  { %v830_v8 = vadd.f32 1.0, %v1268_v56 }
 0x9f9   :  { %1269 = vrcp.f32 %v830_v8  ;;  %v843_v58 = vand.u32 2147483648, %v830_v8  ;;  %vm837_vm15 = vweird.f32 %v830_v8  ;;  %v841_v3 = vand.u32 2147483647, %v830_v8 }
 0x9fb   :  { %v844_v7 = vor.u32 1.1754944e-38, %v843_v58  ;;  %vm842_vm2 = vcmp.eq.f32.partialorder %v841_v3, 8.507059e+37 }
 0x9ff   :  { %v1270_v59 = vpop.eup %1269 }
 0xa00   :  { %v833_v60 = vmul.f32 %v1270_v59, %v830_v8  ;;  %vm838_vm14 = vweird.f32 %v1270_v59 }
 0xa01   :  { %vm839_vm0 = vmor %vm837_vm15, %vm838_vm14 }
 0xa02   :  { %v834_v61 = vsub.f32 1.0, %v833_v60 }
 0xa04   :  { %v835_v62 = vmul.f32 %v1270_v59, %v834_v61 }
 0xa06   :  { %v836_v63 = vadd.f32 %v1270_v59, %v835_v62 }
 0xa08   :  { %v840_v5 = vsel %vm839_vm0, %v1270_v59, %v836_v63 }
 0xa09   :  { %v845_v14 = vsel %vm842_vm2, %v844_v7, %v840_v5 }
 0xa0a   :  { %v863_v21 = vmul.f32 %v845_v14, %v771_v30  ;;  %v231_v30 = vadd.f32 %v1749_v2, %v1638_v29 }
 0xa67   :  { %v866_v10 = vpop.permute.xlu0 %865 }
 0xa68   :  { %v868_v18 = vmul.f32 %v866_v10, %v845_v14 }
 0xa6a   :  { %870 = vrot.lane.b32.xlu1 %v868_v18, %s1463_s2 }
 0xadc   :  { %v871_v23 = vpop.permute.xlu1 %870 }
 0xadd   :  { %v873_v28 = vadd.f32 %v871_v23, %v863_v21  ;;  %v234_v21 = vadd.f32 %v1751_v57, %v1638_v29 }
 0xadf   :  { %1271 = vtanh.f32 %v873_v28 }
 0xae0   :  { %1273 = vpow2.f32 %v1178_v1 }
 0xae5   :  { %v1272_v0 = vpop.eup %1271 }
 0xae6   :  { %876 = vrot.lane.b32.xlu2 %v1272_v0, %s1463_s2  ;;  %v1274_v4 = vpop.eup %1273 }
 0xae7   :  { %v831_v6 = vadd.f32 1.0, %v1274_v4  ;;  %v193_v4 = vadd.f32 %v1636_v27, %v1642_v36 }
 0xae9   :  { %1275 = vrcp.f32 %v831_v6  ;;  %v858_v19 = vand.u32 2147483648, %v831_v6  ;;  %vm852_vm4 = vweird.f32 %v831_v6  ;;  %v856_v16 = vand.u32 2147483647, %v831_v6 }
 0xaeb   :  { %v859_v20 = vor.u32 1.1754944e-38, %v858_v19  ;;  %vm857_vm5 = vcmp.eq.f32.partialorder %v856_v16, 8.507059e+37 }
 0xaef   :  { %v1276_v11 = vpop.eup %1275 }
 0xaf0   :  { %v848_v9 = vmul.f32 %v1276_v11, %v831_v6  ;;  %vm853_vm3 = vweird.f32 %v1276_v11 }
 0xaf1   :  { %vm854_vm1 = vmor %vm852_vm4, %vm853_vm3 }
 0xaf2   :  { %v849_v12 = vsub.f32 1.0, %v848_v9 }
 0xaf4   :  { %v850_v13 = vmul.f32 %v1276_v11, %v849_v12 }
 0xaf6   :  { %v851_v15 = vadd.f32 %v1276_v11, %v850_v13 }
 0xaf8   :  { %v855_v22 = vsel %vm854_vm1, %v1276_v11, %v851_v15 }
 0xaf9   :  { %v860_v24 = vsel %vm857_vm5, %v859_v20, %v855_v22 }
 0xb40   :  { %v877_v25 = vpop.permute.xlu2 %876 }
 0xb41   :  { %v879_v26 = vmul.f32 %v877_v25, %v860_v24 }
 0xb43   :  { %1179 = vmatmul.msk.f32.vlgmr.msra.gmra.mxu0 %vm270_vm10, %v879_v26  ;;  %1180 = vmatmul.msk.f32.vlgmr.msrb.gmra.mxu1 %vm270_vm10, %v879_v26  ;;  %v1091_v26 = vld [vmem:[#allocation11 + $0x38] sm:$0xff] }
 0xb44   :  { %1107 = vmatpush.msrb.mxu0 %v1091_v26 }
 0xbc0   :  { %v923_v31 = vpop.f32.mrf.mxu1  ;;  %v903_v34 = vpop.f32.mrf.mxu0 }
 0xbc1   :  { %v924_v32 = vadd.f32 %v923_v31, %v231_v30  ;;  %v904_v37 = vadd.f32 %v903_v34, %v190_v35  ;;  %v1090_v30 = vld [vmem:[#allocation11 + $0x30] sm:$0xff]  ;;  %v1089_v31 = vld [vmem:[#allocation11 + $0x28] sm:$0xff] }
 0xbc2   :  { %1108 = vmatpush.msrb.mxu0 %v1090_v30  ;;  %v1086_v34 = vld [vmem:[#allocation11 + $0x10] sm:$0xff]  ;;  %v1085_v35 = vld [vmem:[#allocation11 + $0x8] sm:$0xff] }
 0xbc3   :  { %1277 = vtanh.f32 %v924_v32  ;;  %v1181_v38 = vmul.f32 -1.442695, %v904_v37  ;;  %v1182_v55 = vmul.f32 -1.442695, %v924_v32  ;;  %v1088_v32 = vld [vmem:[#allocation11 + $0x20] sm:$0xff] }
 0xbc4   :  { %1109 = vmatpush.msrb.mxu0 %v1089_v31 }
 0xbc5   :  { %1279 = vpow2.f32 %v1181_v38 }
 0xbc6   :  { %1110 = vmatpush.msrb.mxu0 %v1088_v32 }
 0xbc9   :  { %v1278_v33 = vpop.eup %1277 }
 0xbca   :  { %967 = vrot.lane.b32.xlu0 %v1278_v33, %s1463_s2  ;;  %v1087_v33 = vld [vmem:[#allocation11 + $0x18] sm:$0xff] }
 0xbcb   :  { %v1280_v39 = vpop.eup %1279  ;;  %1111 = vmatpush.msrb.mxu0 %v1087_v33 }
 0xbcc   :  { %v932_v40 = vadd.f32 1.0, %v1280_v39 }
 0xbcd   :  { %1112 = vmatpush.msrb.mxu0 %v1086_v34 }
 0xbce   :  { %1281 = vrcp.f32 %v932_v40  ;;  %v945_v45 = vand.u32 2147483648, %v932_v40  ;;  %vm939_vm7 = vweird.f32 %v932_v40  ;;  %v943_v46 = vand.u32 2147483647, %v932_v40 }
 0xbcf   :  { %1113 = vmatpush.msrb.mxu0 %v1085_v35 }
 0xbd0   :  { %v946_v48 = vor.u32 1.1754944e-38, %v945_v45  ;;  %vm944_vm9 = vcmp.eq.f32.partialorder %v943_v46, 8.507059e+37 }
 0xbd4   :  { %v1282_v41 = vpop.eup %1281 }
 0xbd5   :  { %v935_v42 = vmul.f32 %v1282_v41, %v932_v40  ;;  %vm940_vm6 = vweird.f32 %v1282_v41 }
 0xbd6   :  { %vm941_vm8 = vmor %vm939_vm7, %vm940_vm6 }
 0xbd7   :  { %v936_v43 = vsub.f32 1.0, %v935_v42 }
 0xbd9   :  { %v937_v2 = vmul.f32 %v1282_v41, %v936_v43 }
 0xbdb   :  { %v938_v44 = vadd.f32 %v1282_v41, %v937_v2  ;;  %v1084_v2 = vld [vmem:[#allocation11] sm:$0xff] }
 0xbdc   :  { %1114 = vmatpush.msrb.mxu0 %v1084_v2 }
 0xbdd   :  { %v942_v47 = vsel %vm941_vm8, %v1282_v41, %v938_v44 }
 0xbde   :  { %v947_v49 = vsel %vm944_vm9, %v946_v48, %v942_v47 }
 0xbdf   :  { %v965_v51 = vmul.f32 %v947_v49, %v873_v28 }
 0xc3c   :  { %v968_v17 = vpop.permute.xlu0 %967 }
 0xc3d   :  { %v970_v50 = vmul.f32 %v968_v17, %v947_v49 }
 0xc3f   :  { %972 = vrot.lane.b32.xlu1 %v970_v50, %s1463_s2 }
 0xcb1   :  { %v973_v52 = vpop.permute.xlu1 %972 }
 0xcb2   :  { %v1780_v53 = vadd.f32 %v973_v52, %v965_v51 }
 0xcb4   :  { %1283 = vtanh.f32 %v1780_v53 }
 0xcb5   :  { %1285 = vpow2.f32 %v1182_v55  ;;  %v1204_v55 = vld [vmem:[%s1806_s5] ss:$0 sm:$0xff] }
 0xcba   :  { %v1284_v54 = vpop.eup %1283 }
 0xcbb   :  { %978 = vrot.lane.b32.xlu2 %v1284_v54, %s1463_s2  ;;  %v1286_v56 = vpop.eup %1285 }
 0xcbc   :  { %v933_v8 = vadd.f32 1.0, %v1286_v56 }
 0xcbe   :  { %1287 = vrcp.f32 %v933_v8  ;;  %v960_v58 = vand.u32 2147483648, %v933_v8  ;;  %vm954_vm12 = vweird.f32 %v933_v8  ;;  %v958_v3 = vand.u32 2147483647, %v933_v8 }
 0xcc0   :  { %v961_v7 = vor.u32 1.1754944e-38, %v960_v58  ;;  %vm959_vm14 = vcmp.eq.f32.partialorder %v958_v3, 8.507059e+37 }
 0xcc4   :  { %v1288_v59 = vpop.eup %1287 }
 0xcc5   :  { %v950_v60 = vmul.f32 %v1288_v59, %v933_v8  ;;  %vm955_vm11 = vweird.f32 %v1288_v59 }
 0xcc6   :  { %vm956_vm13 = vmor %vm954_vm12, %vm955_vm11 }
 0xcc7   :  { %v951_v61 = vsub.f32 1.0, %v950_v60 }
 0xcc9   :  { %v952_v62 = vmul.f32 %v1288_v59, %v951_v61 }
 0xccb   :  { %v953_v63 = vadd.f32 %v1288_v59, %v952_v62 }
 0xccd   :  { %v957_v5 = vsel %vm956_vm13, %v1288_v59, %v953_v63 }
 0xcce   :  { %v962_v10 = vsel %vm959_vm14, %v961_v7, %v957_v5 }
 0xd15   :  { %v979_v14 = vpop.permute.xlu2 %978 }
 0xd16   :  { %v981_v18 = vmul.f32 %v979_v14, %v962_v10 }
 0xd18   :  { %1183 = vmatmul.msk.f32.vlgmr.msrb.gmra.mxu2 %vm270_vm10, %v981_v18  ;;  %1184 = vmatmul.msk.f32.vlgmr.msrb.gmra.mxu3 %vm270_vm10, %v981_v18 }
 0xd9b   :  { %v1025_v23 = vpop.f32.mrf.mxu3  ;;  %v1005_v1 = vpop.f32.mrf.mxu2 }
 0xd9c   :  { %v1026_v28 = vadd.f32 %v1025_v23, %v234_v21  ;;  %v1006_v6 = vadd.f32 %v1005_v1, %v193_v4 }
 0xd9e   :  { %1289 = vtanh.f32 %v1026_v28  ;;  %v1185_v11 = vmul.f32 -1.442695, %v1006_v6  ;;  %v1186_v41 = vmul.f32 -1.442695, %v1026_v28 }
 0xda0   :  { %1291 = vpow2.f32 %v1185_v11 }
 0xda4   :  { %v1290_v0 = vpop.eup %1289 }
 0xda5   :  { %1069 = vrot.lane.b32.xlu0 %v1290_v0, %s1463_s2 }
 0xda6   :  { %v1292_v9 = vpop.eup %1291 }
 0xda7   :  { %v1034_v12 = vadd.f32 1.0, %v1292_v9 }
 0xda9   :  { %1293 = vrcp.f32 %v1034_v12  ;;  %v1047_v16 = vand.u32 2147483648, %v1034_v12  ;;  %vm1041_vm0 = vweird.f32 %v1034_v12  ;;  %v1045_v22 = vand.u32 2147483647, %v1034_v12 }
 0xdab   :  { %v1048_v24 = vor.u32 1.1754944e-38, %v1047_v16  ;;  %vm1046_vm3 = vcmp.eq.f32.partialorder %v1045_v22, 8.507059e+37 }
 0xdaf   :  { %v1294_v13 = vpop.eup %1293 }
 0xdb0   :  { %v1037_v15 = vmul.f32 %v1294_v13, %v1034_v12  ;;  %vm1042_vm15 = vweird.f32 %v1294_v13 }
 0xdb1   :  { %vm1043_vm2 = vmor %vm1041_vm0, %vm1042_vm15 }
 0xdb2   :  { %v1038_v19 = vsub.f32 1.0, %v1037_v15 }
 0xdb4   :  { %v1039_v29 = vmul.f32 %v1294_v13, %v1038_v19 }
 0xdb6   :  { %v1040_v57 = vadd.f32 %v1294_v13, %v1039_v29 }
 0xdb8   :  { %v1044_v20 = vsel %vm1043_vm2, %v1294_v13, %v1040_v57 }
 0xdb9   :  { %v1049_v36 = vsel %vm1046_vm3, %v1048_v24, %v1044_v20 }
 0xdba   :  { %v1067_v37 = vmul.f32 %v1049_v36, %v1780_v53 }
 0xe17   :  { %v1070_v27 = vpop.permute.xlu0 %1069 }
 0xe18   :  { %v1072_v25 = vmul.f32 %v1070_v27, %v1049_v36 }
 0xe1a   :  { %1074 = vrot.lane.b32.xlu1 %v1072_v25, %s1463_s2 }
 0xe8c   :  { %v1075_v38 = vpop.permute.xlu1 %1074 }
 0xe8d   :  { %v1077_v39 = vadd.f32 %v1075_v38, %v1067_v37 }
 0xe8f   :  { %1295 = vtanh.f32 %v1077_v39 }
 0xe90   :  { %1297 = vpow2.f32 %v1186_v41 }
 0xe95   :  { %v1296_v40 = vpop.eup %1295 }
 0xe96   :  { %1080 = vrot.lane.b32.xlu2 %v1296_v40, %s1463_s2  ;;  %v1298_v42 = vpop.eup %1297 }
 0xe97   :  { %v1035_v43 = vadd.f32 1.0, %v1298_v42 }
 0xe99   :  { %1299 = vrcp.f32 %v1035_v43  ;;  %v1062_v17 = vand.u32 2147483648, %v1035_v43  ;;  %vm1056_vm1 = vweird.f32 %v1035_v43  ;;  %v1060_v49 = vand.u32 2147483647, %v1035_v43 }
 0xe9b   :  { %v1063_v51 = vor.u32 1.1754944e-38, %v1062_v17  ;;  %vm1061_vm6 = vcmp.eq.f32.partialorder %v1060_v49, 8.507059e+37 }
 0xe9f   :  { %v1300_v44 = vpop.eup %1299 }
 0xea0   :  { %v1052_v45 = vmul.f32 %v1300_v44, %v1035_v43  ;;  %vm1057_vm4 = vweird.f32 %v1300_v44 }
 0xea1   :  { %vm1058_vm5 = vmor %vm1056_vm1, %vm1057_vm4 }
 0xea2   :  { %v1053_v46 = vsub.f32 1.0, %v1052_v45 }
 0xea4   :  { %v1054_v47 = vmul.f32 %v1300_v44, %v1053_v46 }
 0xea6   :  { %v1055_v48 = vadd.f32 %v1300_v44, %v1054_v47 }
 0xea8   :  { %v1059_v50 = vsel %vm1058_vm5, %v1300_v44, %v1055_v48 }
 0xea9   :  { %v1064_v52 = vsel %vm1061_vm6, %v1063_v51, %v1059_v50 }
 0xef0   :  { %v1081_v53 = vpop.permute.xlu2 %1080 }
 0xef1   :  { %v1083_v54 = vmul.f32 %v1081_v53, %v1064_v52 }
 0xef3   :  { %1187 = vmatmul.msk.f32.vlgmr.msrb.gmra.mxu0 %vm270_vm10, %v1083_v54 }
 0xf70   :  { %v1116_v56 = vpop.f32.mrf.mxu0 }
 0xf71   :  { %v1117_v8 = vadd.f32 %v1204_v55, %v1116_v56 }
 0xf73   :  { %1119 = vst [vmem:[#allocation12] sm:$0xff] %v1117_v8 }
 0xf74   :  { %1130 = dma.vmem_to_hbm [thread:$0]  %s1126_s25, 128, %s1128_s28, [#allocation5]  }
 0xf75   :  { %1451 = dma.done.wait [#allocation5], 128  }
 0xf76   :  { %1452 = vsyncadd [#allocation5], 4294967168 }
 0xf77   :  { %1135 = vsyncpa [#allocation4], 1 }
 0xf78   :  { %1136 = vsyncpa [#allocation7], 1 }
 0xf79   :  { %1137 = vsyncpa [#allocation10], 1 }
 0xf7a   :  { %1138 = vsyncpa [#allocation5], 1 }

</bundles_post_ra>
